<compile_context>
chip_gen: v7x
topology: tpu7x:2x2x1
jax: 0.10.0
libtpu: 0.0.40
codegen_flags: <defaults>
</compile_context>

<pallas_src>
import jax
import jax.numpy as jnp
import numpy as np
from jax import lax
from jax.experimental import pallas as pl
from jax.experimental.pallas import tpu as pltpu


def _round_up(x, m):
    return (x + m - 1) // m * m


def _make_mlpae_kernel(n_enc, n_dec, compute_dtype):
    """Kernel for an AE with n_enc encoder and n_dec decoder Linears."""
    n_w = n_enc + n_dec

    def kernel(*refs):
        x_ref = refs[0]
        w_refs = refs[1:1 + n_w]          # block-diag, pre-transposed (in, out)
        xx_ref = refs[1 + n_w]
        enc_ref = refs[2 + n_w]

        h = x_ref[...]
        # ---- encoder: ReLU on all but the last layer ----
        for i in range(n_enc):
            h = jnp.dot(h.astype(compute_dtype), w_refs[i][...],
                        preferred_element_type=jnp.float32)
            if i < n_enc - 1:
                h = jnp.maximum(h, 0.0)
        enc_ref[...] = h.astype(enc_ref.dtype)

        # ---- decoder: ReLU on all but the last layer ----
        for i in range(n_dec):
            h = jnp.dot(h.astype(compute_dtype), w_refs[n_enc + i][...],
                        preferred_element_type=jnp.float32)
            if i < n_dec - 1:
                h = jnp.maximum(h, 0.0)
        xx_ref[...] = h.astype(xx_ref.dtype)

    return kernel


def _choose_pack_factor(layer_dims, itemsize, weight_cap_bytes):
    """Pick P (power of two) so the narrowest activation spans >=128 lanes,
    capped so the kron-packed weights (which grow as P^2) stay small."""
    min_dim = min(min(d) for d in layer_dims)
    P = 1
    while P * min_dim < 128 and P < 128:
        P *= 2

    def wbytes(p):
        return sum(p * din * p * dout * itemsize for din, dout in layer_dims)

    while P > 1 and wbytes(P) > weight_cap_bytes:
        P //= 2
    return P


def mlp_ae_forward(x, enc_weights, dec_weights, *, use_bf16=False,
                   act_vmem_budget=24 << 20, weight_cap_bytes=8 << 20):
    """Fused MlpAE forward.

    x           : (B, n_features) float32
    enc_weights : list of torch-style Linear weights, each (out, in)
    dec_weights : list of torch-style Linear weights, each (out, in)
    Returns (xx, enc) with shapes (B, n_features), (B, n_emb), both float32.
    """
    B, F = x.shape
    n_emb = enc_weights[-1].shape[0]
    n_enc, n_dec = len(enc_weights), len(dec_weights)

    compute_dtype = jnp.bfloat16 if use_bf16 else jnp.float32
    itemsize = jnp.dtype(compute_dtype).itemsize

    all_ws = [jnp.asarray(w) for w in (*enc_weights, *dec_weights)]
    layer_dims = [(w.shape[1], w.shape[0]) for w in all_ws]   # (in, out)

    # ---- lane packing: P samples per packed row; block-diag kron weights ----
    P = _choose_pack_factor(layer_dims, itemsize, weight_cap_bytes)
    eye = jnp.eye(P, dtype=jnp.float32)
    w_ts = [jnp.kron(eye, w.T.astype(jnp.float32)).astype(compute_dtype)
            for w in all_ws]

    Fp = P * F                              # packed input/output width
    Ep = P * n_emb                          # packed embedding width
    max_hid_p = P * max(max(d) for d in layer_dims)

    # ---- row tiling over the packed batch, sized against a VMEM budget ----
    R = pl.cdiv(B, P)                       # packed rows needed
    weight_bytes = sum(int(np.prod(w.shape)) * itemsize for w in w_ts)
    # double-buffered x / xx / enc tiles + one widest f32 intermediate
    per_row = 2 * (Fp * itemsize + Fp * 4 + Ep * 4) + max_hid_p * 4
    avail = max(act_vmem_budget - weight_bytes, 1 << 20)
    max_rows = max(8, min(4096, (avail // per_row) // 8 * 8))

    if R <= max_rows:
        if R >= 16:
            # >=2 grid steps so both v7x TensorCores get work (no-op v5e/v6e)
            tb_rows = _round_up(pl.cdiv(R, 2), 8)
        else:
            tb_rows = R                     # single full-array block
    else:
        tb_rows = max_rows
    R_pad = _round_up(R, tb_rows)
    grid = (R_pad // tb_rows,)

    # ---- pack x: (B, F) -> (R_pad, P*F); zero-pad rows are safe (bias=False,
    #      no BatchNorm), padded outputs are sliced off below. ----
    B_pad = R_pad * P
    x_in = x.astype(compute_dtype)
    if B_pad != B:
        x_in = jnp.pad(x_in, ((0, B_pad - B), (0, 0)))
    x_in = x_in.reshape(R_pad, Fp)

    kernel = _make_mlpae_kernel(n_enc, n_dec, compute_dtype)

    # Weights are constant across the grid: whole-array VMEM residency,
    # no pipelining / double-buffering.
    weight_specs = [pl.BlockSpec(memory_space=pltpu.MemorySpace.VMEM)
                    for _ in w_ts]

    flops = 2 * R_pad * sum(P * din * P * dout for din, dout in layer_dims)
    bytes_accessed = int(x_in.size) * itemsize + weight_bytes \
        + R_pad * (Fp + Ep) * 4
    cost = pl.CostEstimate(flops=flops, transcendentals=0,
                           bytes_accessed=bytes_accessed)

    xx_p, enc_p = pl.pallas_call(
        kernel,
        out_shape=(jax.ShapeDtypeStruct((R_pad, Fp), jnp.float32),
                   jax.ShapeDtypeStruct((R_pad, Ep), jnp.float32)),
        grid=grid,
        in_specs=[pl.BlockSpec((tb_rows, Fp), lambda r: (r, 0))] + weight_specs,
        out_specs=(pl.BlockSpec((tb_rows, Fp), lambda r: (r, 0)),
                   pl.BlockSpec((tb_rows, Ep), lambda r: (r, 0))),
        compiler_params=pltpu.CompilerParams(
            dimension_semantics=("parallel",),
            vmem_limit_bytes=48 << 20),
        cost_estimate=cost,
    )(x_in, *w_ts)

    # ---- unpack back to per-sample layout and drop padding (wrapper-side) ----
    xx = xx_p.reshape(B_pad, F)[:B]
    enc = enc_p.reshape(B_pad, n_emb)[:B]
    return xx, enc


def reference_forward(x, enc_weights, dec_weights):
    """Pure-JAX reference of MlpAE.forward (bias=False, defaults)."""
    h = x
    for i, w in enumerate(enc_weights):
        h = jnp.dot(h, w.T, precision=lax.Precision.HIGHEST)
        if i < len(enc_weights) - 1:
            h = jax.nn.relu(h)
    enc = h
    for i, w in enumerate(dec_weights):
        h = jnp.dot(h, w.T, precision=lax.Precision.HIGHEST)
        if i < len(dec_weights) - 1:
            h = jax.nn.relu(h)
    return h, enc


if __name__ == "__main__":
    # Small shapes consistent with the module: batch=8, n_features=16,
    # n_hidden=[32, 16], n_emb=8.
    B, n_features, n_hidden, n_emb = 8, 16, [32, 16], 8

    enc_dims = [n_features] + n_hidden + [n_emb]          # 16 -> 32 -> 16 -> 8
    dec_dims = [n_emb] + n_hidden[::-1] + [n_features]    # 8 -> 16 -> 32 -> 16

    n_layers = (len(enc_dims) - 1) + (len(dec_dims) - 1)
    keys = jax.random.split(jax.random.PRNGKey(0), 1 + n_layers)

    x = jax.random.normal(keys[0], (B, n_features), dtype=jnp.float32)

    # torch.nn.Linear-style weights (out, in), deterministic init.
    enc_ws, dec_ws, ki = [], [], 1
    for i in range(len(enc_dims) - 1):
        enc_ws.append(jax.random.normal(
            keys[ki], (enc_dims[i + 1], enc_dims[i]), jnp.float32)
            / np.sqrt(enc_dims[i]))
        ki += 1
    for i in range(len(dec_dims) - 1):
        dec_ws.append(jax.random.normal(
            keys[ki], (dec_dims[i + 1], dec_dims[i]), jnp.float32)
            / np.sqrt(dec_dims[i]))
        ki += 1

    xx_ref, enc_ref = reference_forward(x, enc_ws, dec_ws)

    # f32 path: strict tolerance.
    xx, enc = mlp_ae_forward(x, enc_ws, dec_ws, use_bf16=False)
    jax.block_until_ready((xx, enc))
    np.testing.assert_allclose(np.asarray(enc), np.asarray(enc_ref),
                               rtol=1e-4, atol=1e-4)
    np.testing.assert_allclose(np.asarray(xx), np.asarray(xx_ref),
                               rtol=1e-4, atol=1e-4)

    # bf16 matmul-input path (v6e/v7x MXU peak): looser tolerance.
    xx_bf, enc_bf = mlp_ae_forward(x, enc_ws, dec_ws, use_bf16=True)
    jax.block_until_ready((xx_bf, enc_bf))
    np.testing.assert_allclose(np.asarray(enc_bf), np.asarray(enc_ref),
                               rtol=1e-1, atol=1e-1)
    np.testing.assert_allclose(np.asarray(xx_bf), np.asarray(xx_ref),
                               rtol=1e-1, atol=1e-1)

    print("KERNEL_OK")
</pallas_src>

<mosaic_0001>
module attributes {stable_mosaic.version = 11 : i64} {
  func.func @kernel(%arg0: i32, %arg1: memref<1x256xf32, #tpu.memory_space<vmem>>, %arg2: memref<256x512xf32, #tpu.memory_space<vmem>>, %arg3: memref<512x256xf32, #tpu.memory_space<vmem>>, %arg4: memref<256x128xf32, #tpu.memory_space<vmem>>, %arg5: memref<128x256xf32, #tpu.memory_space<vmem>>, %arg6: memref<256x512xf32, #tpu.memory_space<vmem>>, %arg7: memref<512x256xf32, #tpu.memory_space<vmem>>, %arg8: memref<1x256xf32, #tpu.memory_space<vmem>>, %arg9: memref<1x128xf32, #tpu.memory_space<vmem>>) attributes {dimension_semantics = [#tpu.dimension_semantics<parallel>], iteration_bounds = array<i64: 1>, scalar_prefetch = 0 : i64, scratch_operands = 0 : i64, tpu.core_type = #tpu.core_type<tc>, window_params = [{transform_indices = @transform_0, window_bounds = array<i64: 1, 256>}, {pipeline_mode = #tpu.pipeline_mode<synchronous>, transform_indices = @transform_1, window_bounds = array<i64: 256, 512>}, {pipeline_mode = #tpu.pipeline_mode<synchronous>, transform_indices = @transform_2, window_bounds = array<i64: 512, 256>}, {pipeline_mode = #tpu.pipeline_mode<synchronous>, transform_indices = @transform_3, window_bounds = array<i64: 256, 128>}, {pipeline_mode = #tpu.pipeline_mode<synchronous>, transform_indices = @transform_4, window_bounds = array<i64: 128, 256>}, {pipeline_mode = #tpu.pipeline_mode<synchronous>, transform_indices = @transform_5, window_bounds = array<i64: 256, 512>}, {pipeline_mode = #tpu.pipeline_mode<synchronous>, transform_indices = @transform_6, window_bounds = array<i64: 512, 256>}, {transform_indices = @transform_7, window_bounds = array<i64: 1, 256>}, {transform_indices = @transform_8, window_bounds = array<i64: 1, 128>}]} {
    %c0 = arith.constant 0 : index
    %c0_0 = arith.constant 0 : index
    %0 = vector.load %arg1[%c0, %c0_0] : memref<1x256xf32, #tpu.memory_space<vmem>>, vector<1x256xf32>
    %c0_1 = arith.constant 0 : index
    %c0_2 = arith.constant 0 : index
    %1 = vector.load %arg2[%c0_1, %c0_2] : memref<256x512xf32, #tpu.memory_space<vmem>>, vector<256x512xf32>
    %cst = arith.constant dense<0.000000e+00> : vector<1x512xf32>
    %2 = tpu.matmul %0, %1, %cst {dimension_numbers = #tpu.dot_dimension_numbers<[1], [0], [0], [1], [0, 0, 1, 1], [], []>} : vector<1x256xf32>, vector<256x512xf32>, vector<1x512xf32> -> vector<1x512xf32>
    %cst_3 = arith.constant 0.000000e+00 : f32
    %3 = vector.broadcast %cst_3 : f32 to vector<1x512xf32>
    %4 = arith.maximumf %2, %3 : vector<1x512xf32>
    %c0_4 = arith.constant 0 : index
    %c0_5 = arith.constant 0 : index
    %5 = vector.load %arg3[%c0_4, %c0_5] : memref<512x256xf32, #tpu.memory_space<vmem>>, vector<512x256xf32>
    %cst_6 = arith.constant dense<0.000000e+00> : vector<1x256xf32>
    %6 = tpu.matmul %4, %5, %cst_6 {dimension_numbers = #tpu.dot_dimension_numbers<[1], [0], [0], [1], [0, 0, 1, 1], [], []>} : vector<1x512xf32>, vector<512x256xf32>, vector<1x256xf32> -> vector<1x256xf32>
    %cst_7 = arith.constant 0.000000e+00 : f32
    %7 = vector.broadcast %cst_7 : f32 to vector<1x256xf32>
    %8 = arith.maximumf %6, %7 : vector<1x256xf32>
    %c0_8 = arith.constant 0 : index
    %c0_9 = arith.constant 0 : index
    %9 = vector.load %arg4[%c0_8, %c0_9] : memref<256x128xf32, #tpu.memory_space<vmem>>, vector<256x128xf32>
    %cst_10 = arith.constant dense<0.000000e+00> : vector<1x128xf32>
    %10 = tpu.matmul %8, %9, %cst_10 {dimension_numbers = #tpu.dot_dimension_numbers<[1], [0], [0], [1], [0, 0, 1, 1], [], []>} : vector<1x256xf32>, vector<256x128xf32>, vector<1x128xf32> -> vector<1x128xf32>
    %c0_11 = arith.constant 0 : index
    %c0_12 = arith.constant 0 : index
    %11 = vector.load %arg9[%c0_11, %c0_12] : memref<1x128xf32, #tpu.memory_space<vmem>>, vector<1x128xf32>
    tpu.vector_store %arg9[%c0_11, %c0_12], %10 {strides = array<i32>} : memref<1x128xf32, #tpu.memory_space<vmem>>, vector<1x128xf32>,
    %c0_13 = arith.constant 0 : index
    %c0_14 = arith.constant 0 : index
    %12 = vector.load %arg5[%c0_13, %c0_14] : memref<128x256xf32, #tpu.memory_space<vmem>>, vector<128x256xf32>
    %cst_15 = arith.constant dense<0.000000e+00> : vector<1x256xf32>
    %13 = tpu.matmul %10, %12, %cst_15 {dimension_numbers = #tpu.dot_dimension_numbers<[1], [0], [0], [1], [0, 0, 1, 1], [], []>} : vector<1x128xf32>, vector<128x256xf32>, vector<1x256xf32> -> vector<1x256xf32>
    %cst_16 = arith.constant 0.000000e+00 : f32
    %14 = vector.broadcast %cst_16 : f32 to vector<1x256xf32>
    %15 = arith.maximumf %13, %14 : vector<1x256xf32>
    %c0_17 = arith.constant 0 : index
    %c0_18 = arith.constant 0 : index
    %16 = vector.load %arg6[%c0_17, %c0_18] : memref<256x512xf32, #tpu.memory_space<vmem>>, vector<256x512xf32>
    %cst_19 = arith.constant dense<0.000000e+00> : vector<1x512xf32>
    %17 = tpu.matmul %15, %16, %cst_19 {dimension_numbers = #tpu.dot_dimension_numbers<[1], [0], [0], [1], [0, 0, 1, 1], [], []>} : vector<1x256xf32>, vector<256x512xf32>, vector<1x512xf32> -> vector<1x512xf32>
    %cst_20 = arith.constant 0.000000e+00 : f32
    %18 = vector.broadcast %cst_20 : f32 to vector<1x512xf32>
    %19 = arith.maximumf %17, %18 : vector<1x512xf32>
    %c0_21 = arith.constant 0 : index
    %c0_22 = arith.constant 0 : index
    %20 = vector.load %arg7[%c0_21, %c0_22] : memref<512x256xf32, #tpu.memory_space<vmem>>, vector<512x256xf32>
    %cst_23 = arith.constant dense<0.000000e+00> : vector<1x256xf32>
    %21 = tpu.matmul %19, %20, %cst_23 {dimension_numbers = #tpu.dot_dimension_numbers<[1], [0], [0], [1], [0, 0, 1, 1], [], []>} : vector<1x512xf32>, vector<512x256xf32>, vector<1x256xf32> -> vector<1x256xf32>
    %c0_24 = arith.constant 0 : index
    %c0_25 = arith.constant 0 : index
    %22 = vector.load %arg8[%c0_24, %c0_25] : memref<1x256xf32, #tpu.memory_space<vmem>>, vector<1x256xf32>
    tpu.vector_store %arg8[%c0_24, %c0_25], %21 {strides = array<i32>} : memref<1x256xf32, #tpu.memory_space<vmem>>, vector<1x256xf32>,
    return
  }
  func.func @transform_0(%arg0: i32) -> (i32, i32) {
    %c0_i32 = arith.constant 0 : i32
    %c0_i32_0 = arith.constant 0 : i32
    return %arg0, %c0_i32 : i32, i32
  }
  func.func @transform_1(%arg0: i32) -> (i32, i32) {
    %c0_i32 = arith.constant 0 : i32
    %c0_i32_0 = arith.constant 0 : i32
    %c0_i32_1 = arith.constant 0 : i32
    return %c0_i32, %c0_i32_0 : i32, i32
  }
  func.func @transform_2(%arg0: i32) -> (i32, i32) {
    %c0_i32 = arith.constant 0 : i32
    %c0_i32_0 = arith.constant 0 : i32
    %c0_i32_1 = arith.constant 0 : i32
    return %c0_i32, %c0_i32_0 : i32, i32
  }
  func.func @transform_3(%arg0: i32) -> (i32, i32) {
    %c0_i32 = arith.constant 0 : i32
    %c0_i32_0 = arith.constant 0 : i32
    %c0_i32_1 = arith.constant 0 : i32
    return %c0_i32, %c0_i32_0 : i32, i32
  }
  func.func @transform_4(%arg0: i32) -> (i32, i32) {
    %c0_i32 = arith.constant 0 : i32
    %c0_i32_0 = arith.constant 0 : i32
    %c0_i32_1 = arith.constant 0 : i32
    return %c0_i32, %c0_i32_0 : i32, i32
  }
  func.func @transform_5(%arg0: i32) -> (i32, i32) {
    %c0_i32 = arith.constant 0 : i32
    %c0_i32_0 = arith.constant 0 : i32
    %c0_i32_1 = arith.constant 0 : i32
    return %c0_i32, %c0_i32_0 : i32, i32
  }
  func.func @transform_6(%arg0: i32) -> (i32, i32) {
    %c0_i32 = arith.constant 0 : i32
    %c0_i32_0 = arith.constant 0 : i32
    %c0_i32_1 = arith.constant 0 : i32
    return %c0_i32, %c0_i32_0 : i32, i32
  }
  func.func @transform_7(%arg0: i32) -> (i32, i32) {
    %c0_i32 = arith.constant 0 : i32
    %c0_i32_0 = arith.constant 0 : i32
    return %arg0, %c0_i32 : i32, i32
  }
  func.func @transform_8(%arg0: i32) -> (i32, i32) {
    %c0_i32 = arith.constant 0 : i32
    %c0_i32_0 = arith.constant 0 : i32
    return %arg0, %c0_i32 : i32, i32
  }
}

</mosaic_0001>

<bundles_post_ra>
// kernel: tpu_custom_call.1
= control target key start
LH: loop header
LB: loop body
LE: loop exit
PB: predicated region body
PF: predicated region fallthrough
CT: control target
= control target key end

     0   :  { %14 = vsyncpa [#allocation3], 0  ;;  %s2536_s0 = inlined_call_operand.hbm [shape: f32[1,256], index: 0, kind: input, shape index: {}]   ;;  %s2537_s1 = inlined_call_operand.hbm [shape: f32[256,512], index: 1, kind: input, shape index: {}]   ;;  %s2538_s2 = inlined_call_operand.hbm [shape: f32[512,256], index: 2, kind: input, shape index: {}]   ;;  %s2539_s3 = inlined_call_operand.hbm [shape: f32[256,128], index: 3, kind: input, shape index: {}]   ;;  %s2540_s4 = inlined_call_operand.hbm [shape: f32[128,256], index: 4, kind: input, shape index: {}]   ;;  %s2541_s5 = inlined_call_operand.hbm [shape: f32[256,512], index: 5, kind: input, shape index: {}]   ;;  %s2542_s6 = inlined_call_operand.hbm [shape: f32[512,256], index: 6, kind: input, shape index: {}]   ;;  %s2543_s7 = inlined_call_operand.hbm [shape: f32[1,256], index: 7, kind: output, shape index: {0}]   ;;  %s2544_s8 = inlined_call_operand.hbm [shape: f32[1,128], index: 8, kind: output, shape index: {1}]  }
   0x1   :  { %15 = vsyncpa [#allocation6], 0 }
   0x2   :  { %16 = vsyncpa [#allocation9], 0 }
   0x3   :  { %17 = vsyncpa [#allocation12], 0 }
   0x4   :  { %18 = vsyncpa [#allocation4], 0 }
   0x5   :  { %19 = vsyncpa [#allocation16], 0  ;;  %s2330_s27 = smov [#allocation5]   ;;  %s2120_s9 = scalar_lea.hbm %s2537_s1, 16384 }
   0x6   :  { %s35_s28 = sshll.u32 %s2330_s27, 4  ;;  %p2121_p0 = scmp.ne.s32.totalorder %s2537_s1, %s2120_s9  ;;  %s36_s28 = int_to_ptr.vmem [resolvable:$true] %s35_s28 }
   0x7   :  { %p2124_p1 = scmp.lt.u32.totalorder %s2120_s9, %s2537_s1 }
   0x9   :  { %p2126_p2 = pnand %p2124_p1, %p2121_p0 }
   0xb   :  { %2129 = shalt.err (!%p2126_p2)
}
   0xc   :  { %s2130_s14 = scalar_lea.vmem %s36_s28, 16384  ;;  %p2135_p4 = scmp.lt.s32.totalorder %s36_s28, %s36_s28 }
   0xd   :  { %p2131_p3 = scmp.ne.s32.totalorder %s36_s28, %s2130_s14  ;;  %p2136_p5 = scmp.lt.s32.totalorder %s2130_s14, %s2130_s14 }
   0xf   :  { %p2137_p6 = por %p2136_p5, %p2135_p4 }
  0x11   :  { %p2138_p7 = pnand %p2137_p6, %p2131_p3 }
  0x13   :  { %2141 = shalt.err (!%p2138_p7)
}
  0x14   :  { %s2331_s15 = smov 512   ;;  %s2332_s16 = smov 32  }
  0x15   :  { %41 = dma.hbm_to_vmem [thread:$0]  %s2537_s1, 16384, %s36_s28, [#allocation6], %s2331_s15, %s2331_s15, %s2332_s16  }
  0x16   :  { %s2333_s19 = smov [#allocation8]   ;;  %s2142_s23 = scalar_lea.hbm %s2539_s3, 4096 }
  0x17   :  { %s59_s20 = sshll.u32 %s2333_s19, 4  ;;  %p2143_p8 = scmp.ne.s32.totalorder %s2539_s3, %s2142_s23  ;;  %s60_s20 = int_to_ptr.vmem [resolvable:$true] %s59_s20 }
  0x18   :  { %p2146_p9 = scmp.lt.u32.totalorder %s2142_s23, %s2539_s3 }
  0x1a   :  { %p2148_p10 = pnand %p2146_p9, %p2143_p8 }
  0x1c   :  { %2151 = shalt.err (!%p2148_p10)
}
  0x1d   :  { %s2152_s29 = scalar_lea.vmem %s60_s20, 4096  ;;  %p2157_p12 = scmp.lt.s32.totalorder %s60_s20, %s60_s20 }
  0x1e   :  { %p2153_p11 = scmp.ne.s32.totalorder %s60_s20, %s2152_s29  ;;  %p2158_p13 = scmp.lt.s32.totalorder %s2152_s29, %s2152_s29 }
  0x20   :  { %p2159_p0 = por %p2158_p13, %p2157_p12 }
  0x22   :  { %p2160_p1 = pnand %p2159_p0, %p2153_p11 }
  0x24   :  { %2163 = shalt.err (!%p2160_p1)
}
  0x25   :  { %s2334_s1 = smov 128   ;;  %s2335_s28 = smov 8  }
  0x26   :  { %65 = dma.hbm_to_vmem [thread:$0]  %s2539_s3, 4096, %s60_s20, [#allocation9], %s2334_s1, %s2334_s1, %s2335_s28  }
  0x27   :  { %s2336_s10 = smov [#allocation11]   ;;  %s2337_s12 = smov [#allocation2]  }
  0x28   :  { %s83_s11 = sshll.u32 %s2336_s10, 4  ;;  %s26_s13 = sshll.u32 %s2337_s12, 4  ;;  %s84_s11 = int_to_ptr.vmem [resolvable:$true] %s83_s11  ;;  %s27_s13 = int_to_ptr.vmem [resolvable:$true] %s26_s13 }
  0x29   :  { %s2164_s18 = scalar_lea.hbm %s2541_s5, 16384 }
  0x2a   :  { %p2165_p2 = scmp.ne.s32.totalorder %s2541_s5, %s2164_s18  ;;  %p2168_p3 = scmp.lt.u32.totalorder %s2164_s18, %s2541_s5 }
  0x2c   :  { %p2170_p4 = pnand %p2168_p3, %p2165_p2 }
  0x2e   :  { %2173 = shalt.err (!%p2170_p4)
}
  0x2f   :  { %s2174_s3 = scalar_lea.vmem %s84_s11, 16384  ;;  %p2179_p6 = scmp.lt.s32.totalorder %s84_s11, %s84_s11 }
  0x30   :  { %p2175_p5 = scmp.ne.s32.totalorder %s84_s11, %s2174_s3  ;;  %p2180_p7 = scmp.lt.s32.totalorder %s2174_s3, %s2174_s3 }
  0x32   :  { %p2181_p8 = por %p2180_p7, %p2179_p6 }
  0x34   :  { %p2182_p9 = pnand %p2181_p8, %p2175_p5 }
  0x36   :  { %2185 = shalt.err (!%p2182_p9)
}
  0x37   :  { %89 = dma.hbm_to_vmem [thread:$0]  %s2541_s5, 16384, %s84_s11, [#allocation12], %s2331_s15, %s2331_s15, %s2332_s16  }
  0x38   :  { %s2186_s27 = scalar_lea.hbm %s2536_s0, 32 }
  0x39   :  { %p2187_p10 = scmp.ne.s32.totalorder %s2536_s0, %s2186_s27  ;;  %p2190_p11 = scmp.lt.u32.totalorder %s2186_s27, %s2536_s0 }
  0x3b   :  { %p2192_p12 = pnand %p2190_p11, %p2187_p10 }
  0x3d   :  { %2195 = shalt.err (!%p2192_p12)
}
  0x3e   :  { %s2196_s9 = scalar_lea.vmem %s27_s13, 32  ;;  %p2201_p0 = scmp.lt.s32.totalorder %s27_s13, %s27_s13 }
  0x3f   :  { %p2197_p13 = scmp.ne.s32.totalorder %s27_s13, %s2196_s9  ;;  %p2202_p1 = scmp.lt.s32.totalorder %s2196_s9, %s2196_s9 }
  0x41   :  { %p2203_p2 = por %p2202_p1, %p2201_p0 }
  0x43   :  { %p2204_p3 = pnand %p2203_p2, %p2197_p13 }
  0x45   :  { %2207 = shalt.err (!%p2204_p3)
}
  0x46   :  { %29 = dma.hbm_to_vmem [thread:$0]  %s2536_s0, 32, %s27_s13, [#allocation3]  }
  0x47   :  { %s2338_s16 = smov [#allocation7]   ;;  %s2208_s14 = scalar_lea.hbm %s2538_s2, 16384 }
  0x48   :  { %s47_s10 = sshll.u32 %s2338_s16, 4  ;;  %p2209_p4 = scmp.ne.s32.totalorder %s2538_s2, %s2208_s14  ;;  %s48_s10 = int_to_ptr.vmem [resolvable:$true] %s47_s10 }
  0x49   :  { %p2212_p5 = scmp.lt.u32.totalorder %s2208_s14, %s2538_s2 }
  0x4b   :  { %p2214_p6 = pnand %p2212_p5, %p2209_p4 }
  0x4d   :  { %2217 = shalt.err (!%p2214_p6)
}
  0x4e   :  { %s2218_s22 = scalar_lea.vmem %s48_s10, 16384  ;;  %p2223_p8 = scmp.lt.s32.totalorder %s48_s10, %s48_s10 }
  0x4f   :  { %p2219_p7 = scmp.ne.s32.totalorder %s48_s10, %s2218_s22  ;;  %p2224_p9 = scmp.lt.s32.totalorder %s2218_s22, %s2218_s22 }
  0x51   :  { %p2225_p10 = por %p2224_p9, %p2223_p8 }
  0x53   :  { %p2226_p11 = pnand %p2225_p10, %p2219_p7 }
  0x55   :  { %2229 = shalt.err (!%p2226_p11)
}
  0x56   :  { %s2339_s0 = smov 256   ;;  %s2340_s13 = smov 16  }
  0x57   :  { %53 = dma.hbm_to_vmem [thread:$0]  %s2538_s2, 16384, %s48_s10, [#allocation6], %s2339_s0, %s2339_s0, %s2340_s13  }
  0x58   :  { %s2341_s20 = smov [#allocation10]   ;;  %s2342_s25 = smov [#allocation13]  }
  0x59   :  { %s71_s24 = sshll.u32 %s2341_s20, 4  ;;  %s95_s26 = sshll.u32 %s2342_s25, 4  ;;  %s72_s24 = int_to_ptr.vmem [resolvable:$true] %s71_s24  ;;  %s96_s26 = int_to_ptr.vmem [resolvable:$true] %s95_s26 }
  0x5a   :  { %s2230_s1 = scalar_lea.hbm %s2540_s4, 4096 }
  0x5b   :  { %p2231_p12 = scmp.ne.s32.totalorder %s2540_s4, %s2230_s1  ;;  %p2234_p13 = scmp.lt.u32.totalorder %s2230_s1, %s2540_s4 }
  0x5d   :  { %p2236_p0 = pnand %p2234_p13, %p2231_p12 }
  0x5f   :  { %2239 = shalt.err (!%p2236_p0)
}
  0x60   :  { %s2240_s2 = scalar_lea.vmem %s72_s24, 4096  ;;  %p2245_p2 = scmp.lt.s32.totalorder %s72_s24, %s72_s24 }
  0x61   :  { %p2241_p1 = scmp.ne.s32.totalorder %s72_s24, %s2240_s2  ;;  %p2246_p3 = scmp.lt.s32.totalorder %s2240_s2, %s2240_s2 }
  0x63   :  { %p2247_p4 = por %p2246_p3, %p2245_p2 }
  0x65   :  { %p2248_p5 = pnand %p2247_p4, %p2241_p1 }
  0x67   :  { %2251 = shalt.err (!%p2248_p5)
}
  0x68   :  { %77 = dma.hbm_to_vmem [thread:$0]  %s2540_s4, 4096, %s72_s24, [#allocation9], %s2339_s0, %s2339_s0, %s2340_s13  }
  0x69   :  { %s2252_s12 = scalar_lea.hbm %s2542_s6, 16384 }
  0x6a   :  { %p2253_p6 = scmp.ne.s32.totalorder %s2542_s6, %s2252_s12  ;;  %p2256_p7 = scmp.lt.u32.totalorder %s2252_s12, %s2542_s6 }
  0x6c   :  { %p2258_p8 = pnand %p2256_p7, %p2253_p6 }
  0x6e   :  { %2261 = shalt.err (!%p2258_p8)
}
  0x6f   :  { %s2262_s21 = scalar_lea.vmem %s96_s26, 16384  ;;  %p2267_p10 = scmp.lt.s32.totalorder %s96_s26, %s96_s26 }
  0x70   :  { %p2263_p9 = scmp.ne.s32.totalorder %s96_s26, %s2262_s21  ;;  %p2268_p11 = scmp.lt.s32.totalorder %s2262_s21, %s2262_s21 }
  0x72   :  { %p2269_p12 = por %p2268_p11, %p2267_p10 }
  0x74   :  { %p2270_p13 = pnand %p2269_p12, %p2263_p9 }
  0x76   :  { %2273 = shalt.err (!%p2270_p13)
}
  0x77   :  { %101 = dma.hbm_to_vmem [thread:$0]  %s2542_s6, 16384, %s96_s26, [#allocation12], %s2339_s0, %s2339_s0, %s2340_s13  }
  0x78   :  { %2318 = dma.done.wait [#allocation3], 32  }
  0x79   :  { %2319 = vsyncadd [#allocation3], 4294967264 }
  0x7a   :  { %2320 = dma.done.wait [#allocation6], 32768  }
  0x7b   :  { %2321 = vsyncadd [#allocation6], 4294934528 }
  0x7c   :  { %2322 = dma.done.wait [#allocation9], 8192  }
  0x7d   :  { %2323 = vsyncadd [#allocation9], 4294959104 }
  0x7e   :  { %2324 = dma.done.wait [#allocation12], 32768  }
  0x7f   :  { %2325 = vsyncadd [#allocation12], 4294934528  ;;  %v125_v0 = vld [vmem:[#allocation5 + $0x8] sm:$0xff]  ;;  %v124_v2 = vld [vmem:[#allocation5] sm:$0xff]  ;;  %v253_v25 = vlaneseq  ;;  %s2344_s6 = smov [#allocation15]  }
  0x80   :  { %v129_v1 = vld [vmem:[#allocation5 + $0x28] sm:$0xff]  ;;  %v128_v4 = vld [vmem:[#allocation5 + $0x20] sm:$0xff]  ;;  %v127_v46 = vld [vmem:[#allocation5 + $0x18] sm:$0xff]  ;;  %s1472_s0 = sshll.u32 %s2344_s6, 4  ;;  %s1473_s0 = int_to_ptr.vmem [resolvable:$true] %s1472_s0 }
  0x81   :  { %v1523_v3 = vpack.c.bf16 %v129_v1, %v125_v0  ;;  %v133_v5 = vld [vmem:[#allocation5 + $0x48] sm:$0xff]  ;;  %v1525_v7 = vpack.c.bf16 %v128_v4, %v124_v2  ;;  %v132_v9 = vld [vmem:[#allocation5 + $0x40] sm:$0xff]  ;;  %v2492_v32 = vshrl.u32 %v253_v25, 7  ;;  %v131_v47 = vld [vmem:[#allocation5 + $0x38] sm:$0xff]  ;;  %s2274_s13 = scalar_lea.vmem %s1473_s0, 16  ;;  %s2278_s23 = scalar_lea.vmem %s1473_s0, 32 }
  0x82   :  { %v137_v6 = vld [vmem:[#allocation5 + $0x68] sm:$0xff]  ;;  %v136_v10 = vld [vmem:[#allocation5 + $0x60] sm:$0xff]  ;;  %v1587_v48 = vpack.c.bf16 %v131_v47, %v127_v46  ;;  %v2495_v49 = vld [vmem:[#allocation2] sm:$0x3]  ;;  %p2275_p0 = scmp.ne.s32.totalorder %s1473_s0, %s2274_s13  ;;  %p2279_p1 = scmp.lt.s32.totalorder %s1473_s0, %s1473_s0 }
  0x83   :  { %v1527_v8 = vpack.c.bf16 %v137_v6, %v133_v5  ;;  %v141_v11 = vld [vmem:[#allocation5 + $0x88] sm:$0xff]  ;;  %1524 = vmatprep.subr.bf16.mxu0 %v1523_v3  ;;  %v1529_v13 = vpack.c.bf16 %v136_v10, %v132_v9  ;;  %v140_v15 = vld [vmem:[#allocation5 + $0x80] sm:$0xff]  ;;  %v259_v39 = vsub.s32 1, %v2492_v32  ;;  %v126_v50 = vld [vmem:[#allocation5 + $0x10] sm:$0xff]  ;;  %p2280_p2 = scmp.lt.s32.totalorder %s2278_s23, %s2274_s13 }
  0x84   :  { %v145_v12 = vld [vmem:[#allocation5 + $0xa8] sm:$0xff]  ;;  %1526 = vmatpush1.bf16.msra.mxu0 %v1525_v7  ;;  %v144_v16 = vld [vmem:[#allocation5 + $0xa0] sm:$0xff]  ;;  %v130_v51 = vld [vmem:[#allocation5 + $0x30] sm:$0xff]  ;;  %1588 = vmatprep.subr.bf16.mxu1 %v1587_v48 }
  0x85   :  { %1528 = vmatprep.subr.bf16.mxu0 %v1527_v8  ;;  %v1531_v14 = vpack.c.bf16 %v145_v12, %v141_v11  ;;  %v149_v17 = vld [vmem:[#allocation5 + $0xc8] sm:$0xff]  ;;  %v1533_v19 = vpack.c.bf16 %v144_v16, %v140_v15  ;;  %v148_v21 = vld [vmem:[#allocation5 + $0xc0] sm:$0xff]  ;;  %v260_v52 = vrot.slane %v2495_v49, %v259_v39  ;;  %v1589_v53 = vpack.c.bf16 %v130_v51, %v126_v50  ;;  %v135_v54 = vld [vmem:[#allocation5 + $0x58] sm:$0xff]  ;;  %p2281_p3 = por %p2280_p2, %p2279_p1 }
  0x86   :  { %v153_v18 = vld [vmem:[#allocation5 + $0xe8] sm:$0xff]  ;;  %v152_v22 = vld [vmem:[#allocation5 + $0xe0] sm:$0xff]  ;;  %v139_v55 = vld [vmem:[#allocation5 + $0x78] sm:$0xff] }
  0x87   :  { %v1535_v20 = vpack.c.bf16 %v153_v18, %v149_v17  ;;  %v157_v23 = vld [vmem:[#allocation5 + $0x108] sm:$0xff]  ;;  %v1537_v26 = vpack.c.bf16 %v152_v22, %v148_v21  ;;  %v156_v28 = vld [vmem:[#allocation5 + $0x100] sm:$0xff]  ;;  %v134_v56 = vld [vmem:[#allocation5 + $0x50] sm:$0xff]  ;;  %v1591_v58 = vpack.c.bf16 %v139_v55, %v135_v54  ;;  %327 = vmatprep.mubr.f32.mxu0 %v260_v52  ;;  %1590 = vmatpush1.bf16.msra.mxu1 %v1589_v53  ;;  %p2282_p4 = pnand %p2281_p3, %p2275_p0 }
  0x88   :  { %1530 = vmatpush1.bf16.msra.mxu0 %v1529_v13  ;;  %v161_v24 = vld [vmem:[#allocation5 + $0x128] sm:$0xff]  ;;  %v160_v29 = vld [vmem:[#allocation5 + $0x120] sm:$0xff]  ;;  %v138_v59 = vld [vmem:[#allocation5 + $0x70] sm:$0xff]  ;;  %398 = vmatprep.mubr.f32.mxu1 %v260_v52 }
  0x89   :  { %1532 = vmatprep.subr.bf16.mxu0 %v1531_v14  ;;  %v1539_v27 = vpack.c.bf16 %v161_v24, %v157_v23  ;;  %v165_v30 = vld [vmem:[#allocation5 + $0x148] sm:$0xff]  ;;  %v1541_v33 = vpack.c.bf16 %v160_v29, %v156_v28  ;;  %v164_v35 = vld [vmem:[#allocation5 + $0x140] sm:$0xff]  ;;  %v143_v60 = vld [vmem:[#allocation5 + $0x98] sm:$0xff]  ;;  %v1593_v3 = vpack.c.bf16 %v138_v59, %v134_v56  ;;  %1592 = vmatprep.subr.bf16.mxu1 %v1591_v58 }
  0x8a   :  { %v169_v31 = vld [vmem:[#allocation5 + $0x168] sm:$0xff]  ;;  %v168_v36 = vld [vmem:[#allocation5 + $0x160] sm:$0xff]  ;;  %v147_v61 = vld [vmem:[#allocation5 + $0xb8] sm:$0xff] }
  0x8b   :  { %v1543_v34 = vpack.c.bf16 %v169_v31, %v165_v30  ;;  %v173_v37 = vld [vmem:[#allocation5 + $0x188] sm:$0xff]  ;;  %v1545_v40 = vpack.c.bf16 %v168_v36, %v164_v35  ;;  %v172_v41 = vld [vmem:[#allocation5 + $0x180] sm:$0xff]  ;;  %v1595_v4 = vpack.c.bf16 %v147_v61, %v143_v60  ;;  %v142_v5 = vld [vmem:[#allocation5 + $0x90] sm:$0xff]  ;;  %1594 = vmatpush1.bf16.msra.mxu1 %v1593_v3 }
  0x8c   :  { %1534 = vmatpush1.bf16.msra.mxu0 %v1533_v19  ;;  %v177_v38 = vld [vmem:[#allocation5 + $0x1a8] sm:$0xff]  ;;  %v176_v42 = vld [vmem:[#allocation5 + $0x1a0] sm:$0xff]  ;;  %v146_v6 = vld [vmem:[#allocation5 + $0xb0] sm:$0xff] }
  0x8d   :  { %1536 = vmatprep.subr.bf16.mxu0 %v1535_v20  ;;  %v181_v43 = vld [vmem:[#allocation5 + $0x1c8] sm:$0xff]  ;;  %v1547_v44 = vpack.c.bf16 %v177_v38, %v173_v37  ;;  %v1549_v57 = vpack.c.bf16 %v176_v42, %v172_v41  ;;  %v180_v63 = vld [vmem:[#allocation5 + $0x1c0] sm:$0xff]  ;;  %v151_v8 = vld [vmem:[#allocation5 + $0xd8] sm:$0xff]  ;;  %v1597_v15 = vpack.c.bf16 %v146_v6, %v142_v5  ;;  %1596 = vmatprep.subr.bf16.mxu1 %v1595_v4 }
  0x8e   :  { %v185_v45 = vld [vmem:[#allocation5 + $0x1e8] sm:$0xff]  ;;  %v184_v0 = vld [vmem:[#allocation5 + $0x1e0] sm:$0xff]  ;;  %v155_v9 = vld [vmem:[#allocation5 + $0xf8] sm:$0xff] }
  0x8f   :  { %v1551_v62 = vpack.c.bf16 %v185_v45, %v181_v43  ;;  %v189_v1 = vld [vmem:[#allocation5 + $0x208] sm:$0xff]  ;;  %v1553_v7 = vpack.c.bf16 %v184_v0, %v180_v63  ;;  %v188_v11 = vld [vmem:[#allocation5 + $0x200] sm:$0xff]  ;;  %v1599_v16 = vpack.c.bf16 %v155_v9, %v151_v8  ;;  %v150_v17 = vld [vmem:[#allocation5 + $0xd0] sm:$0xff]  ;;  %1598 = vmatpush1.bf16.msra.mxu1 %v1597_v15 }
  0x90   :  { %1538 = vmatpush1.bf16.msra.mxu0 %v1537_v26  ;;  %v193_v2 = vld [vmem:[#allocation5 + $0x228] sm:$0xff]  ;;  %v192_v12 = vld [vmem:[#allocation5 + $0x220] sm:$0xff]  ;;  %v154_v18 = vld [vmem:[#allocation5 + $0xf0] sm:$0xff] }
  0x91   :  { %1540 = vmatprep.subr.bf16.mxu0 %v1539_v27  ;;  %v1555_v10 = vpack.c.bf16 %v193_v2, %v189_v1  ;;  %v197_v13 = vld [vmem:[#allocation5 + $0x248] sm:$0xff]  ;;  %v1557_v19 = vpack.c.bf16 %v192_v12, %v188_v11  ;;  %v159_v20 = vld [vmem:[#allocation5 + $0x118] sm:$0xff]  ;;  %v196_v23 = vld [vmem:[#allocation5 + $0x240] sm:$0xff]  ;;  %v1601_v28 = vpack.c.bf16 %v154_v18, %v150_v17  ;;  %1600 = vmatprep.subr.bf16.mxu1 %v1599_v16 }
  0x92   :  { %v201_v14 = vld [vmem:[#allocation5 + $0x268] sm:$0xff]  ;;  %v163_v21 = vld [vmem:[#allocation5 + $0x138] sm:$0xff]  ;;  %v200_v24 = vld [vmem:[#allocation5 + $0x260] sm:$0xff] }
  0x93   :  { %v1559_v22 = vpack.c.bf16 %v201_v14, %v197_v13  ;;  %v205_v26 = vld [vmem:[#allocation5 + $0x288] sm:$0xff]  ;;  %v1603_v29 = vpack.c.bf16 %v163_v21, %v159_v20  ;;  %v158_v30 = vld [vmem:[#allocation5 + $0x110] sm:$0xff]  ;;  %v171_v35 = vld [vmem:[#allocation5 + $0x178] sm:$0xff]  ;;  %1602 = vmatpush1.bf16.msra.mxu1 %v1601_v28 }
  0x94   :  { %1542 = vmatpush1.bf16.msra.mxu0 %v1541_v33  ;;  %v209_v27 = vld [vmem:[#allocation5 + $0x2a8] sm:$0xff]  ;;  %v162_v31 = vld [vmem:[#allocation5 + $0x130] sm:$0xff]  ;;  %v1561_v33 = vpack.c.bf16 %v200_v24, %v196_v23  ;;  %v204_v37 = vld [vmem:[#allocation5 + $0x280] sm:$0xff] }
  0x95   :  { %1544 = vmatprep.subr.bf16.mxu0 %v1543_v34  ;;  %v167_v34 = vld [vmem:[#allocation5 + $0x158] sm:$0xff]  ;;  %v1563_v36 = vpack.c.bf16 %v209_v27, %v205_v26  ;;  %v208_v38 = vld [vmem:[#allocation5 + $0x2a0] sm:$0xff]  ;;  %v213_v39 = vld [vmem:[#allocation5 + $0x2c8] sm:$0xff]  ;;  %v1605_v41 = vpack.c.bf16 %v162_v31, %v158_v30  ;;  %1604 = vmatprep.subr.bf16.mxu1 %v1603_v29 }
  0x96   :  { %v1607_v42 = vpack.c.bf16 %v171_v35, %v167_v34  ;;  %v166_v43 = vld [vmem:[#allocation5 + $0x150] sm:$0xff]  ;;  %v1565_v45 = vpack.c.bf16 %v208_v38, %v204_v37  ;;  %v175_v46 = vld [vmem:[#allocation5 + $0x198] sm:$0xff]  ;;  %v212_v50 = vld [vmem:[#allocation5 + $0x2c0] sm:$0xff] }
  0x97   :  { %v179_v47 = vld [vmem:[#allocation5 + $0x1b8] sm:$0xff]  ;;  %v216_v51 = vld [vmem:[#allocation5 + $0x2e0] sm:$0xff]  ;;  %v221_v52 = vld [vmem:[#allocation5 + $0x308] sm:$0xff]  ;;  %1606 = vmatpush1.bf16.msra.mxu1 %v1605_v41  ;;  %v255_v41 = vsub.s32 0, %v2492_v32 }
  0x98   :  { %1546 = vmatpush1.bf16.msra.mxu0 %v1545_v40  ;;  %v217_v40 = vld [vmem:[#allocation5 + $0x2e8] sm:$0xff]  ;;  %1608 = vmatprep.subr.bf16.mxu1 %v1607_v42  ;;  %v1611_v55 = vpack.c.bf16 %v179_v47, %v175_v46  ;;  %v174_v56 = vld [vmem:[#allocation5 + $0x190] sm:$0xff]  ;;  %v1569_v58 = vpack.c.bf16 %v216_v51, %v212_v50  ;;  %v183_v59 = vld [vmem:[#allocation5 + $0x1d8] sm:$0xff] }
  0x99   :  { %1548 = vmatprep.subr.bf16.mxu0 %v1547_v44  ;;  %v170_v44 = vld [vmem:[#allocation5 + $0x170] sm:$0xff]  ;;  %v1567_v48 = vpack.c.bf16 %v217_v40, %v213_v39  ;;  %v225_v53 = vld [vmem:[#allocation5 + $0x328] sm:$0xff]  ;;  %v187_v60 = vld [vmem:[#allocation5 + $0x1f8] sm:$0xff] }
  0x9a   :  { %v1609_v54 = vpack.c.bf16 %v170_v44, %v166_v43  ;;  %v1571_v61 = vpack.c.bf16 %v225_v53, %v221_v52  ;;  %v224_v63 = vld [vmem:[#allocation5 + $0x320] sm:$0xff]  ;;  %v229_v0 = vld [vmem:[#allocation5 + $0x348] sm:$0xff]  ;;  %v1615_v3 = vpack.c.bf16 %v187_v60, %v183_v59  ;;  %v182_v4 = vld [vmem:[#allocation5 + $0x1d0] sm:$0xff] }
  0x9b   :  { %v233_v1 = vld [vmem:[#allocation5 + $0x368] sm:$0xff]  ;;  %v186_v5 = vld [vmem:[#allocation5 + $0x1f0] sm:$0xff]  ;;  %v195_v8 = vld [vmem:[#allocation5 + $0x238] sm:$0xff] }
  0x9c   :  { %1550 = vmatpush1.bf16.msra.mxu0 %v1549_v57  ;;  %v178_v57 = vld [vmem:[#allocation5 + $0x1b0] sm:$0xff]  ;;  %1610 = vmatpush1.bf16.msra.mxu1 %v1609_v54  ;;  %v1575_v9 = vpack.c.bf16 %v233_v1, %v229_v0  ;;  %v232_v11 = vld [vmem:[#allocation5 + $0x360] sm:$0xff]  ;;  %v237_v12 = vld [vmem:[#allocation5 + $0x388] sm:$0xff]  ;;  %v1617_v14 = vpack.c.bf16 %v186_v5, %v182_v4 }
  0x9d   :  { %1552 = vmatprep.subr.bf16.mxu0 %v1551_v62  ;;  %v220_v62 = vld [vmem:[#allocation5 + $0x300] sm:$0xff]  ;;  %v1613_v2 = vpack.c.bf16 %v178_v57, %v174_v56  ;;  %1612 = vmatprep.subr.bf16.mxu1 %v1611_v55  ;;  %v241_v13 = vld [vmem:[#allocation5 + $0x3a8] sm:$0xff]  ;;  %v190_v16 = vld [vmem:[#allocation5 + $0x210] sm:$0xff]  ;;  %v2500_v55 = vrot.slane %v2495_v49, %v255_v41 }
  0x9e   :  { %v1573_v6 = vpack.c.bf16 %v224_v63, %v220_v62  ;;  %v194_v17 = vld [vmem:[#allocation5 + $0x230] sm:$0xff]  ;;  %v203_v20 = vld [vmem:[#allocation5 + $0x278] sm:$0xff]  ;;  %v1579_v21 = vpack.c.bf16 %v241_v13, %v237_v12  ;;  %v240_v23 = vld [vmem:[#allocation5 + $0x3a0] sm:$0xff] }
  0x9f   :  { %v245_v24 = vld [vmem:[#allocation5 + $0x3c8] sm:$0xff]  ;;  %v1621_v27 = vpack.c.bf16 %v194_v17, %v190_v16  ;;  %v198_v29 = vld [vmem:[#allocation5 + $0x250] sm:$0xff]  ;;  %v211_v34 = vld [vmem:[#allocation5 + $0x2b8] sm:$0xff] }
  0xa0   :  { %1554 = vmatpush1.bf16.msra.mxu0 %v1553_v7  ;;  %v191_v7 = vld [vmem:[#allocation5 + $0x218] sm:$0xff]  ;;  %1614 = vmatpush1.bf16.msra.mxu1 %v1613_v2  ;;  %v249_v26 = vld [vmem:[#allocation5 + $0x3e8] sm:$0xff]  ;;  %v202_v30 = vld [vmem:[#allocation5 + $0x270] sm:$0xff] }
  0xa1   :  { %1556 = vmatprep.subr.bf16.mxu0 %v1555_v10  ;;  %v228_v10 = vld [vmem:[#allocation5 + $0x340] sm:$0xff]  ;;  %1616 = vmatprep.subr.bf16.mxu1 %v1615_v3  ;;  %v1619_v15 = vpack.c.bf16 %v195_v8, %v191_v7  ;;  %v1583_v35 = vpack.c.bf16 %v249_v26, %v245_v24  ;;  %v1625_v38 = vpack.c.bf16 %v202_v30, %v198_v29  ;;  %v410_v39 = vld [vmem:[#allocation7 + $0x8] sm:$0xff]  ;;  %v412_v40 = vld [vmem:[#allocation7 + $0x18] sm:$0xff] }
  0xa2   :  { %v1577_v18 = vpack.c.bf16 %v232_v11, %v228_v10  ;;  %v248_v37 = vld [vmem:[#allocation5 + $0x3e0] sm:$0xff]  ;;  %v206_v43 = vld [vmem:[#allocation5 + $0x290] sm:$0xff]  ;;  %v215_v46 = vld [vmem:[#allocation5 + $0x2d8] sm:$0xff] }
  0xa3   :  { %v210_v44 = vld [vmem:[#allocation5 + $0x2b0] sm:$0xff]  ;;  %v219_v47 = vld [vmem:[#allocation5 + $0x2f8] sm:$0xff]  ;;  %v409_v50 = vld [vmem:[#allocation7] sm:$0xff] }
  0xa4   :  { %1558 = vmatpush1.bf16.msra.mxu0 %v1557_v19  ;;  %v199_v19 = vld [vmem:[#allocation5 + $0x258] sm:$0xff]  ;;  %1618 = vmatpush1.bf16.msra.mxu1 %v1617_v14  ;;  %v411_v51 = vld [vmem:[#allocation7 + $0x10] sm:$0xff]  ;;  %v1629_v52 = vpack.c.bf16 %v210_v44, %v206_v43  ;;  %v414_v53 = vld [vmem:[#allocation7 + $0x28] sm:$0xff]  ;;  %v1631_v56 = vpack.c.bf16 %v219_v47, %v215_v46 }
  0xa5   :  { %1560 = vmatprep.subr.bf16.mxu0 %v1559_v22  ;;  %v236_v22 = vld [vmem:[#allocation5 + $0x380] sm:$0xff]  ;;  %1620 = vmatprep.subr.bf16.mxu1 %v1619_v15  ;;  %v1623_v28 = vpack.c.bf16 %v203_v20, %v199_v19  ;;  %v416_v54 = vld [vmem:[#allocation7 + $0x38] sm:$0xff]  ;;  %v214_v57 = vld [vmem:[#allocation5 + $0x2d0] sm:$0xff] }
  0xa6   :  { %v1581_v31 = vpack.c.bf16 %v240_v23, %v236_v22  ;;  %v223_v59 = vld [vmem:[#allocation5 + $0x318] sm:$0xff]  ;;  %v1655_v62 = vpack.c.bf16 %v416_v54, %v414_v53  ;;  %v413_v63 = vld [vmem:[#allocation7 + $0x20] sm:$0xff]  ;;  %v415_v0 = vld [vmem:[#allocation7 + $0x30] sm:$0xff] }
  0xa7   :  { %v227_v60 = vld [vmem:[#allocation5 + $0x338] sm:$0xff]  ;;  %v418_v2 = vld [vmem:[#allocation7 + $0x48] sm:$0xff]  ;;  %v222_v4 = vld [vmem:[#allocation5 + $0x310] sm:$0xff]  ;;  %v1657_v8 = vpack.c.bf16 %v415_v0, %v413_v63 }
  0xa8   :  { %1562 = vmatpush1.bf16.msra.mxu0 %v1561_v33  ;;  %v207_v33 = vld [vmem:[#allocation5 + $0x298] sm:$0xff]  ;;  %1622 = vmatpush1.bf16.msra.mxu1 %v1621_v27  ;;  %v1635_v49 = vpack.c.bf16 %v227_v60, %v223_v59  ;;  %v226_v5 = vld [vmem:[#allocation5 + $0x330] sm:$0xff]  ;;  %v417_v10 = vld [vmem:[#allocation7 + $0x40] sm:$0xff] }
  0xa9   :  { %1564 = vmatprep.subr.bf16.mxu0 %v1563_v36  ;;  %v244_v36 = vld [vmem:[#allocation5 + $0x3c0] sm:$0xff]  ;;  %1624 = vmatprep.subr.bf16.mxu1 %v1623_v28  ;;  %v1627_v42 = vpack.c.bf16 %v211_v34, %v207_v33  ;;  %v420_v3 = vld [vmem:[#allocation7 + $0x58] sm:$0xff]  ;;  %v419_v11 = vld [vmem:[#allocation7 + $0x50] sm:$0xff]  ;;  %v1637_v12 = vpack.c.bf16 %v226_v5, %v222_v4 }
  0xaa   :  { %v235_v7 = vld [vmem:[#allocation5 + $0x378] sm:$0xff]  ;;  %v422_v13 = vld [vmem:[#allocation7 + $0x68] sm:$0xff]  ;;  %v230_v16 = vld [vmem:[#allocation5 + $0x350] sm:$0xff]  ;;  %v1661_v20 = vpack.c.bf16 %v419_v11, %v417_v10 }
  0xab   :  { %v424_v14 = vld [vmem:[#allocation7 + $0x78] sm:$0xff]  ;;  %v234_v17 = vld [vmem:[#allocation5 + $0x370] sm:$0xff]  ;;  %v421_v22 = vld [vmem:[#allocation7 + $0x60] sm:$0xff] }
  0xac   :  { %1566 = vmatpush1.bf16.msra.mxu0 %v1565_v45  ;;  %v1585_v45 = vpack.c.bf16 %v248_v37, %v244_v36  ;;  %1626 = vmatpush1.bf16.msra.mxu1 %v1625_v38  ;;  %v243_v19 = vld [vmem:[#allocation5 + $0x3b8] sm:$0xff]  ;;  %v423_v23 = vld [vmem:[#allocation7 + $0x70] sm:$0xff]  ;;  %v1641_v24 = vpack.c.bf16 %v234_v17, %v230_v16  ;;  %v426_v26 = vld [vmem:[#allocation7 + $0x88] sm:$0xff] }
  0xad   :  { %1568 = vmatprep.subr.bf16.mxu0 %v1567_v48  ;;  %v1651_v48 = vpack.c.bf16 %v412_v40, %v410_v39  ;;  %1628 = vmatprep.subr.bf16.mxu1 %v1627_v42  ;;  %v428_v27 = vld [vmem:[#allocation7 + $0x98] sm:$0xff]  ;;  %v238_v29 = vld [vmem:[#allocation5 + $0x390] sm:$0xff]  ;;  %v1665_v34 = vpack.c.bf16 %v423_v23, %v421_v22  ;;  %v425_v36 = vld [vmem:[#allocation7 + $0x80] sm:$0xff] }
  0xae   :  { %v242_v30 = vld [vmem:[#allocation5 + $0x3b0] sm:$0xff]  ;;  %v251_v33 = vld [vmem:[#allocation5 + $0x3f8] sm:$0xff]  ;;  %v430_v39 = vld [vmem:[#allocation7 + $0xa8] sm:$0xff] }
  0xaf   :  { %v427_v37 = vld [vmem:[#allocation7 + $0x90] sm:$0xff]  ;;  %v1645_v38 = vpack.c.bf16 %v242_v30, %v238_v29  ;;  %v432_v40 = vld [vmem:[#allocation7 + $0xb8] sm:$0xff]  ;;  %v429_v46 = vld [vmem:[#allocation7 + $0xa0] sm:$0xff] }
  0xb0   :  { %1570 = vmatpush1.bf16.msra.mxu0 %v1569_v58  ;;  %v218_v58 = vld [vmem:[#allocation5 + $0x2f0] sm:$0xff]  ;;  %1630 = vmatpush1.bf16.msra.mxu1 %v1629_v52  ;;  %v1669_v44 = vpack.c.bf16 %v427_v37, %v425_v36  ;;  %v433_v54 = vld [vmem:[#allocation7 + $0xc0] sm:$0xff]  ;;  %v442_v63 = vld [vmem:[#allocation7 + $0x108] sm:$0xff] }
  0xb1   :  { %1572 = vmatprep.subr.bf16.mxu0 %v1571_v61  ;;  %v1653_v61 = vpack.c.bf16 %v411_v51, %v409_v50  ;;  %v1633_v1 = vpack.c.bf16 %v218_v58, %v214_v57  ;;  %1632 = vmatprep.subr.bf16.mxu1 %v1631_v56  ;;  %v246_v42 = vld [vmem:[#allocation5 + $0x3d0] sm:$0xff]  ;;  %v434_v50 = vld [vmem:[#allocation7 + $0xc8] sm:$0xff]  ;;  %v436_v51 = vld [vmem:[#allocation7 + $0xd8] sm:$0xff] }
  0xb2   :  { %v250_v43 = vld [vmem:[#allocation5 + $0x3f0] sm:$0xff]  ;;  %v1675_v53 = vpack.c.bf16 %v436_v51, %v434_v50  ;;  %v438_v57 = vld [vmem:[#allocation7 + $0xe8] sm:$0xff]  ;;  %v440_v58 = vld [vmem:[#allocation7 + $0xf8] sm:$0xff] }
  0xb3   :  { %v431_v47 = vld [vmem:[#allocation7 + $0xb0] sm:$0xff]  ;;  %v1679_v60 = vpack.c.bf16 %v440_v58, %v438_v57  ;;  %v444_v0 = vld [vmem:[#allocation7 + $0x118] sm:$0xff]  ;;  %v446_v4 = vld [vmem:[#allocation7 + $0x128] sm:$0xff] }
  0xb4   :  { %1574 = vmatpush1.bf16.msra.mxu0 %v1573_v6  ;;  %v231_v6 = vld [vmem:[#allocation5 + $0x358] sm:$0xff]  ;;  %1634 = vmatpush1.bf16.msra.mxu1 %v1633_v1  ;;  %v1673_v52 = vpack.c.bf16 %v431_v47, %v429_v46  ;;  %v435_v56 = vld [vmem:[#allocation7 + $0xd0] sm:$0xff] }
  0xb5   :  { %1576 = vmatprep.subr.bf16.mxu0 %v1575_v9  ;;  %v1659_v9 = vpack.c.bf16 %v420_v3, %v418_v2  ;;  %1636 = vmatprep.subr.bf16.mxu1 %v1635_v49  ;;  %v1639_v15 = vpack.c.bf16 %v235_v7, %v231_v6  ;;  %v1677_v59 = vpack.c.bf16 %v435_v56, %v433_v54  ;;  %v441_v3 = vld [vmem:[#allocation7 + $0x100] sm:$0xff]  ;;  %v443_v49 = vld [vmem:[#allocation7 + $0x110] sm:$0xff]  ;;  %v448_v5 = vld [vmem:[#allocation7 + $0x138] sm:$0xff] }
  0xb6   :  { %v1683_v2 = vpack.c.bf16 %v444_v0, %v442_v63  ;;  %v1685_v6 = vpack.c.bf16 %v443_v49, %v441_v3  ;;  %v1687_v7 = vpack.c.bf16 %v448_v5, %v446_v4  ;;  %v452_v10 = vld [vmem:[#allocation7 + $0x158] sm:$0xff]  ;;  %v471_v46 = vld [vmem:[#allocation7 + $0x1f0] sm:$0xff]  ;;  %v478_v56 = vld [vmem:[#allocation7 + $0x228] sm:$0xff] }
  0xb7   :  { %v456_v16 = vld [vmem:[#allocation7 + $0x178] sm:$0xff]  ;;  %v477_v63 = vld [vmem:[#allocation7 + $0x220] sm:$0xff]  ;;  %v479_v0 = vld [vmem:[#allocation7 + $0x230] sm:$0xff] }
  0xb8   :  { %1578 = vmatpush1.bf16.msra.mxu0 %v1577_v18  ;;  %v239_v18 = vld [vmem:[#allocation5 + $0x398] sm:$0xff]  ;;  %1638 = vmatpush1.bf16.msra.mxu1 %v1637_v12  ;;  %v1721_v3 = vpack.c.bf16 %v479_v0, %v477_v63  ;;  %v481_v4 = vld [vmem:[#allocation7 + $0x240] sm:$0xff]  ;;  %v483_v5 = vld [vmem:[#allocation7 + $0x250] sm:$0xff] }
  0xb9   :  { %1580 = vmatprep.subr.bf16.mxu0 %v1579_v21  ;;  %v1663_v21 = vpack.c.bf16 %v424_v14, %v422_v13  ;;  %1640 = vmatprep.subr.bf16.mxu1 %v1639_v15  ;;  %v1643_v28 = vpack.c.bf16 %v243_v19, %v239_v18  ;;  %v449_v13 = vld [vmem:[#allocation7 + $0x140] sm:$0xff]  ;;  %v451_v14 = vld [vmem:[#allocation7 + $0x150] sm:$0xff]  ;;  %v454_v15 = vld [vmem:[#allocation7 + $0x168] sm:$0xff] }
  0xba   :  { %v1693_v17 = vpack.c.bf16 %v451_v14, %v449_v13  ;;  %v1695_v18 = vpack.c.bf16 %v456_v16, %v454_v15  ;;  %v453_v19 = vld [vmem:[#allocation7 + $0x160] sm:$0xff]  ;;  %v460_v22 = vld [vmem:[#allocation7 + $0x198] sm:$0xff]  ;;  %v491_v16 = vld [vmem:[#allocation7 + $0x290] sm:$0xff] }
  0xbb   :  { %v464_v29 = vld [vmem:[#allocation7 + $0x1b8] sm:$0xff]  ;;  %v489_v15 = vld [vmem:[#allocation7 + $0x280] sm:$0xff] }
  0xbc   :  { %1582 = vmatpush1.bf16.msra.mxu0 %v1581_v31  ;;  %v247_v31 = vld [vmem:[#allocation5 + $0x3d8] sm:$0xff]  ;;  %1642 = vmatpush1.bf16.msra.mxu1 %v1641_v24  ;;  %v517_v0 = vld [vmem:[#allocation7 + $0x360] sm:$0xff] }
  0xbd   :  { %1584 = vmatprep.subr.bf16.mxu0 %v1583_v35  ;;  %v1667_v35 = vpack.c.bf16 %v428_v27, %v426_v26  ;;  %1644 = vmatprep.subr.bf16.mxu1 %v1643_v28  ;;  %v1647_v41 = vpack.c.bf16 %v251_v33, %v247_v31  ;;  %v457_v26 = vld [vmem:[#allocation7 + $0x180] sm:$0xff]  ;;  %v459_v27 = vld [vmem:[#allocation7 + $0x190] sm:$0xff]  ;;  %v462_v28 = vld [vmem:[#allocation7 + $0x1a8] sm:$0xff] }
  0xbe   :  { %v1701_v30 = vpack.c.bf16 %v459_v27, %v457_v26  ;;  %v1703_v31 = vpack.c.bf16 %v464_v29, %v462_v28  ;;  %v461_v33 = vld [vmem:[#allocation7 + $0x1a0] sm:$0xff]  ;;  %v468_v36 = vld [vmem:[#allocation7 + $0x1d8] sm:$0xff] }
  0xbf   :  { %v476_v50 = vld [vmem:[#allocation7 + $0x218] sm:$0xff]  ;;  %v497_v29 = vld [vmem:[#allocation7 + $0x2c0] sm:$0xff] }
  0xc0   :  { %1586 = vmatpush1.bf16.msra.mxu0 %v1585_v45  ;;  %v1671_v45 = vpack.c.bf16 %v432_v40, %v430_v39  ;;  %1646 = vmatpush1.bf16.msra.mxu1 %v1645_v38  ;;  %v465_v39 = vld [vmem:[#allocation7 + $0x1c0] sm:$0xff]  ;;  %v467_v40 = vld [vmem:[#allocation7 + $0x1d0] sm:$0xff]  ;;  %v480_v57 = vld [vmem:[#allocation7 + $0x238] sm:$0xff] }
  0xc1   :  { %1652 = vmatprep.subr.bf16.mxu0 %v1651_v48  ;;  %v1649_v48 = vpack.c.bf16 %v250_v43, %v246_v42  ;;  %1648 = vmatprep.subr.bf16.mxu1 %v1647_v41  ;;  %v1709_v41 = vpack.c.bf16 %v467_v40, %v465_v39  ;;  %v470_v42 = vld [vmem:[#allocation7 + $0x1e8] sm:$0xff]  ;;  %v472_v43 = vld [vmem:[#allocation7 + $0x1f8] sm:$0xff]  ;;  %v503_v39 = vld [vmem:[#allocation7 + $0x2f0] sm:$0xff] }
  0xc2   :  { %v506_v40 = vld [vmem:[#allocation7 + $0x308] sm:$0xff] }
  0xc3   :  { %328 = vmatmul.mubr.f32.vlgmr.msra.gmra.mrb[0].mxu0 %v2500_v55 }
  0xc4   :  { %1654 = vmatpush1.bf16.msra.mxu0 %v1653_v61  ;;  %1650 = vmatpush1.bf16.msra.mxu1 %v1649_v48  ;;  %v437_v61 = vld [vmem:[#allocation7 + $0xe0] sm:$0xff]  ;;  %v474_v48 = vld [vmem:[#allocation7 + $0x208] sm:$0xff] }
  0xc5   :  { %1656 = vmatprep.subr.bf16.mxu0 %v1655_v62  ;;  %v439_v62 = vld [vmem:[#allocation7 + $0xf0] sm:$0xff]  ;;  %v1715_v51 = vpack.c.bf16 %v476_v50, %v474_v48 }
  0xc6   :  { %v1681_v1 = vpack.c.bf16 %v439_v62, %v437_v61  ;;  %v1719_v62 = vpack.c.bf16 %v480_v57, %v478_v56 }
  0xc7   :  { %399 = vmatmul.mubr.f32.vlgmr.msra.gmra.mrb[0].mxu1 %v2500_v55  ;;  %v447_v55 = vld [vmem:[#allocation7 + $0x130] sm:$0xff] }
  0xc8   :  { %1658 = vmatpush1.bf16.msra.mxu0 %v1657_v8  ;;  %v445_v8 = vld [vmem:[#allocation7 + $0x120] sm:$0xff] }
  0xc9   :  { %1660 = vmatprep.subr.bf16.mxu0 %v1659_v9  ;;  %v450_v9 = vld [vmem:[#allocation7 + $0x148] sm:$0xff]  ;;  %v1689_v11 = vpack.c.bf16 %v447_v55, %v445_v8  ;;  %v1725_v8 = vpack.c.bf16 %v483_v5, %v481_v4  ;;  %v521_v5 = vld [vmem:[#allocation7 + $0x380] sm:$0xff] }
  0xca   :  { %v1691_v12 = vpack.c.bf16 %v452_v10, %v450_v9  ;;  %v485_v9 = vld [vmem:[#allocation7 + $0x260] sm:$0xff]  ;;  %v487_v10 = vld [vmem:[#allocation7 + $0x270] sm:$0xff] }
  0xcb   :  { %v1729_v13 = vpack.c.bf16 %v487_v10, %v485_v9  ;;  %v525_v10 = vld [vmem:[#allocation7 + $0x3a0] sm:$0xff] }
  0xcc   :  { %1662 = vmatpush1.bf16.msra.mxu0 %v1661_v20  ;;  %v455_v20 = vld [vmem:[#allocation7 + $0x170] sm:$0xff] }
  0xcd   :  { %1664 = vmatprep.subr.bf16.mxu0 %v1663_v21  ;;  %v458_v21 = vld [vmem:[#allocation7 + $0x188] sm:$0xff]  ;;  %v1697_v23 = vpack.c.bf16 %v455_v20, %v453_v19  ;;  %v1733_v19 = vpack.c.bf16 %v491_v16, %v489_v15  ;;  %v529_v16 = vld [vmem:[#allocation7 + $0x3c0] sm:$0xff] }
  0xce   :  { %v1699_v24 = vpack.c.bf16 %v460_v22, %v458_v21  ;;  %v493_v21 = vld [vmem:[#allocation7 + $0x2a0] sm:$0xff]  ;;  %v495_v22 = vld [vmem:[#allocation7 + $0x2b0] sm:$0xff] }
  0xcf   :  { %v1737_v26 = vpack.c.bf16 %v495_v22, %v493_v21  ;;  %v533_v22 = vld [vmem:[#allocation7 + $0x3e0] sm:$0xff] }
  0xd0   :  { %1666 = vmatpush1.bf16.msra.mxu0 %v1665_v34  ;;  %v463_v34 = vld [vmem:[#allocation7 + $0x1b0] sm:$0xff] }
  0xd1   :  { %1668 = vmatprep.subr.bf16.mxu0 %v1667_v35  ;;  %v466_v35 = vld [vmem:[#allocation7 + $0x1c8] sm:$0xff]  ;;  %v1705_v37 = vpack.c.bf16 %v463_v34, %v461_v33  ;;  %v504_v34 = vld [vmem:[#allocation7 + $0x2f8] sm:$0xff] }
  0xd2   :  { %v1707_v38 = vpack.c.bf16 %v468_v36, %v466_v35  ;;  %v502_v33 = vld [vmem:[#allocation7 + $0x2e8] sm:$0xff] }
  0xd4   :  { %1670 = vmatpush1.bf16.msra.mxu0 %v1669_v44  ;;  %v1711_v44 = vpack.c.bf16 %v472_v43, %v470_v42 }
  0xd5   :  { %1672 = vmatprep.subr.bf16.mxu0 %v1671_v45  ;;  %v469_v45 = vld [vmem:[#allocation7 + $0x1e0] sm:$0xff] }
  0xd6   :  { %v1713_v47 = vpack.c.bf16 %v471_v46, %v469_v45  ;;  %v507_v45 = vld [vmem:[#allocation7 + $0x310] sm:$0xff]  ;;  %v510_v46 = vld [vmem:[#allocation7 + $0x328] sm:$0xff] }
  0xd8   :  { %1674 = vmatpush1.bf16.msra.mxu0 %v1673_v52  ;;  %v473_v52 = vld [vmem:[#allocation7 + $0x200] sm:$0xff] }
  0xd9   :  { %1676 = vmatprep.subr.bf16.mxu0 %v1675_v53  ;;  %v475_v53 = vld [vmem:[#allocation7 + $0x210] sm:$0xff] }
  0xdc   :  { %1678 = vmatpush1.bf16.msra.mxu0 %v1677_v59 }
  0xdd   :  { %1680 = vmatprep.subr.bf16.mxu0 %v1679_v60  ;;  %v1717_v60 = vpack.c.bf16 %v475_v53, %v473_v52  ;;  %v511_v52 = vld [vmem:[#allocation7 + $0x330] sm:$0xff]  ;;  %v514_v53 = vld [vmem:[#allocation7 + $0x348] sm:$0xff] }
  0xe0   :  { %1682 = vmatpush1.bf16.msra.mxu0 %v1681_v1  ;;  %v482_v1 = vld [vmem:[#allocation7 + $0x248] sm:$0xff] }
  0xe1   :  { %1684 = vmatprep.subr.bf16.mxu0 %v1683_v2  ;;  %v484_v2 = vld [vmem:[#allocation7 + $0x258] sm:$0xff] }
  0xe2   :  { %v1723_v49 = vpack.c.bf16 %v484_v2, %v482_v1  ;;  %v519_v1 = vld [vmem:[#allocation7 + $0x370] sm:$0xff]  ;;  %v522_v2 = vld [vmem:[#allocation7 + $0x388] sm:$0xff] }
  0xe4   :  { %1686 = vmatpush1.bf16.msra.mxu0 %v1685_v6  ;;  %v486_v6 = vld [vmem:[#allocation7 + $0x268] sm:$0xff] }
  0xe5   :  { %1688 = vmatprep.subr.bf16.mxu0 %v1687_v7  ;;  %v488_v7 = vld [vmem:[#allocation7 + $0x278] sm:$0xff] }
  0xe6   :  { %v1727_v55 = vpack.c.bf16 %v488_v7, %v486_v6  ;;  %v523_v6 = vld [vmem:[#allocation7 + $0x390] sm:$0xff]  ;;  %v526_v7 = vld [vmem:[#allocation7 + $0x3a8] sm:$0xff] }
  0xe8   :  { %1690 = vmatpush1.bf16.msra.mxu0 %v1689_v11  ;;  %v490_v11 = vld [vmem:[#allocation7 + $0x288] sm:$0xff] }
  0xe9   :  { %1692 = vmatprep.subr.bf16.mxu0 %v1691_v12  ;;  %v492_v12 = vld [vmem:[#allocation7 + $0x298] sm:$0xff] }
  0xea   :  { %v1731_v14 = vpack.c.bf16 %v492_v12, %v490_v11  ;;  %v527_v11 = vld [vmem:[#allocation7 + $0x3b0] sm:$0xff]  ;;  %v530_v12 = vld [vmem:[#allocation7 + $0x3c8] sm:$0xff] }
  0xec   :  { %1694 = vmatpush1.bf16.msra.mxu0 %v1693_v17  ;;  %v494_v17 = vld [vmem:[#allocation7 + $0x2a8] sm:$0xff] }
  0xed   :  { %1696 = vmatprep.subr.bf16.mxu0 %v1695_v18  ;;  %v496_v18 = vld [vmem:[#allocation7 + $0x2b8] sm:$0xff] }
  0xee   :  { %v1735_v20 = vpack.c.bf16 %v496_v18, %v494_v17  ;;  %v531_v17 = vld [vmem:[#allocation7 + $0x3d0] sm:$0xff]  ;;  %v534_v18 = vld [vmem:[#allocation7 + $0x3e8] sm:$0xff] }
  0xf0   :  { %1698 = vmatpush1.bf16.msra.mxu0 %v1697_v23  ;;  %v498_v23 = vld [vmem:[#allocation7 + $0x2c8] sm:$0xff] }
  0xf1   :  { %1700 = vmatprep.subr.bf16.mxu0 %v1699_v24  ;;  %v500_v24 = vld [vmem:[#allocation7 + $0x2d8] sm:$0xff] }
  0xf2   :  { %v1739_v28 = vpack.c.bf16 %v500_v24, %v498_v23  ;;  %v535_v23 = vld [vmem:[#allocation7 + $0x3f0] sm:$0xff]  ;;  %v697_v24 = vld [vmem:[#allocation8 + $0x80] sm:$0xff] }
  0xf4   :  { %1702 = vmatpush1.bf16.msra.mxu0 %v1701_v30  ;;  %v499_v30 = vld [vmem:[#allocation7 + $0x2d0] sm:$0xff] }
  0xf5   :  { %1704 = vmatprep.subr.bf16.mxu0 %v1703_v31  ;;  %v1741_v36 = vpack.c.bf16 %v499_v30, %v497_v29  ;;  %v681_v30 = vld [vmem:[#allocation8] sm:$0xff] }
  0xf8   :  { %1706 = vmatpush1.bf16.msra.mxu0 %v1705_v37  ;;  %v1743_v37 = vpack.c.bf16 %v504_v34, %v502_v33  ;;  %v699_v33 = vld [vmem:[#allocation8 + $0x90] sm:$0xff]  ;;  %v700_v34 = vld [vmem:[#allocation8 + $0x98] sm:$0xff] }
  0xf9   :  { %1708 = vmatprep.subr.bf16.mxu0 %v1707_v38  ;;  %v501_v38 = vld [vmem:[#allocation7 + $0x2e0] sm:$0xff] }
  0xfa   :  { %v1745_v42 = vpack.c.bf16 %v503_v39, %v501_v38  ;;  %v683_v38 = vld [vmem:[#allocation8 + $0x10] sm:$0xff]  ;;  %v684_v39 = vld [vmem:[#allocation8 + $0x18] sm:$0xff] }
  0xfc   :  { %1710 = vmatpush1.bf16.msra.mxu0 %v1709_v41  ;;  %v508_v41 = vld [vmem:[#allocation7 + $0x318] sm:$0xff] }
  0xfd   :  { %1712 = vmatprep.subr.bf16.mxu0 %v1711_v44  ;;  %v1747_v43 = vpack.c.bf16 %v508_v41, %v506_v40  ;;  %v505_v44 = vld [vmem:[#allocation7 + $0x300] sm:$0xff]  ;;  %v702_v41 = vld [vmem:[#allocation8 + $0xa8] sm:$0xff] }
  0xfe   :  { %v1749_v48 = vpack.c.bf16 %v507_v45, %v505_v44  ;;  %v701_v40 = vld [vmem:[#allocation8 + $0xa0] sm:$0xff]  ;;  %v686_v45 = vld [vmem:[#allocation8 + $0x28] sm:$0xff] }
  0xff   :  { %v685_v44 = vld [vmem:[#allocation8 + $0x20] sm:$0xff] }
 0x100   :  { %1714 = vmatpush1.bf16.msra.mxu0 %v1713_v47  ;;  %v512_v47 = vld [vmem:[#allocation7 + $0x338] sm:$0xff] }
 0x101   :  { %1716 = vmatprep.subr.bf16.mxu0 %v1715_v51  ;;  %v1751_v50 = vpack.c.bf16 %v512_v47, %v510_v46  ;;  %v509_v51 = vld [vmem:[#allocation7 + $0x320] sm:$0xff]  ;;  %v703_v46 = vld [vmem:[#allocation8 + $0xb0] sm:$0xff]  ;;  %v704_v47 = vld [vmem:[#allocation8 + $0xb8] sm:$0xff] }
 0x102   :  { %v1753_v56 = vpack.c.bf16 %v511_v52, %v509_v51  ;;  %v688_v51 = vld [vmem:[#allocation8 + $0x38] sm:$0xff]  ;;  %v705_v52 = vld [vmem:[#allocation8 + $0xc0] sm:$0xff] }
 0x196   :  { %v329_v54 = vpop.f32.mrb[0].mxu0 }
 0x197   :  { %v331_v58 = vpop.f32.mrb[1].mxu0  ;;  %v405_v61 = vmax.f32 %v329_v54, 0.0  ;;  %v516_v54 = vld [vmem:[#allocation7 + $0x358] sm:$0xff] }
 0x198   :  { %v406_v59 = vmax.f32 %v331_v58, 0.0  ;;  %v1755_v57 = vpack.c.bf16 %v516_v54, %v514_v53  ;;  %v513_v58 = vld [vmem:[#allocation7 + $0x340] sm:$0xff]  ;;  %v706_v53 = vld [vmem:[#allocation8 + $0xc8] sm:$0xff] }
 0x19a   :  { %601 = vmatprep.mubr.f32.mxu0 %v406_v59  ;;  %v2504_v27 = vpop.f32.mrb[0].mxu1  ;;  %v515_v59 = vld [vmem:[#allocation7 + $0x350] sm:$0xff] }
 0x19b   :  { %602 = vmatmul.mubr.f32.vlgmr.msra.gmra.mrb[2].mxu0 %v405_v61  ;;  %v402_v31 = vpop.f32.mrb[1].mxu1  ;;  %v520_v61 = vld [vmem:[#allocation7 + $0x378] sm:$0xff] }
 0x19c   :  { %1718 = vmatpush1.bf16.msra.mxu0 %v1717_v60  ;;  %v408_v35 = vmax.f32 %v402_v31, 0.0  ;;  %v518_v60 = vld [vmem:[#allocation7 + $0x368] sm:$0xff] }
 0x19d   :  { %1720 = vmatprep.subr.bf16.mxu0 %v1719_v62  ;;  %v1757_v62 = vpack.c.bf16 %v515_v59, %v513_v58  ;;  %v1759_v63 = vpack.c.bf16 %v520_v61, %v518_v60  ;;  %v682_v31 = vld [vmem:[#allocation8 + $0x8] sm:$0xff]  ;;  %v707_v59 = vld [vmem:[#allocation8 + $0xd0] sm:$0xff]  ;;  %v708_v60 = vld [vmem:[#allocation8 + $0xd8] sm:$0xff] }
 0x19e   :  { %672 = vmatprep.mubr.f32.mxu0 %v408_v35  ;;  %v1781_v35 = vpack.c.bf16 %v682_v31, %v681_v30  ;;  %v690_v58 = vld [vmem:[#allocation8 + $0x48] sm:$0xff]  ;;  %v794_v30 = vld [vmem:[#allocation10 + $0x50] sm:$0xff] }
 0x19f   :  { %v797_v31 = vld [vmem:[#allocation10 + $0x68] sm:$0xff] }
 0x1a0   :  { %1722 = vmatpush1.bf16.msra.mxu0 %v1721_v3  ;;  %v524_v3 = vld [vmem:[#allocation7 + $0x398] sm:$0xff] }
 0x1a1   :  { %1724 = vmatprep.subr.bf16.mxu0 %v1723_v49  ;;  %v1761_v49 = vpack.c.bf16 %v519_v1, %v517_v0  ;;  %v1763_v4 = vpack.c.bf16 %v524_v3, %v522_v2  ;;  %v692_v0 = vld [vmem:[#allocation8 + $0x58] sm:$0xff]  ;;  %v709_v1 = vld [vmem:[#allocation8 + $0xe0] sm:$0xff]  ;;  %v710_v2 = vld [vmem:[#allocation8 + $0xe8] sm:$0xff] }
 0x1a4   :  { %1726 = vmatpush1.bf16.msra.mxu0 %v1725_v8  ;;  %v528_v8 = vld [vmem:[#allocation7 + $0x3b8] sm:$0xff] }
 0x1a5   :  { %1728 = vmatprep.subr.bf16.mxu0 %v1727_v55  ;;  %v1765_v55 = vpack.c.bf16 %v523_v6, %v521_v5  ;;  %v1767_v9 = vpack.c.bf16 %v528_v8, %v526_v7  ;;  %v694_v5 = vld [vmem:[#allocation8 + $0x68] sm:$0xff]  ;;  %v711_v7 = vld [vmem:[#allocation8 + $0xf0] sm:$0xff]  ;;  %v712_v8 = vld [vmem:[#allocation8 + $0xf8] sm:$0xff] }
 0x1a8   :  { %1730 = vmatpush1.bf16.msra.mxu0 %v1729_v13  ;;  %v532_v13 = vld [vmem:[#allocation7 + $0x3d8] sm:$0xff] }
 0x1a9   :  { %1732 = vmatprep.subr.bf16.mxu0 %v1731_v14  ;;  %v1769_v14 = vpack.c.bf16 %v527_v11, %v525_v10  ;;  %v1771_v15 = vpack.c.bf16 %v532_v13, %v530_v12  ;;  %v696_v10 = vld [vmem:[#allocation8 + $0x78] sm:$0xff]  ;;  %v785_v12 = vld [vmem:[#allocation10 + $0x8] sm:$0xff] }
 0x1aa   :  { %v787_v13 = vld [vmem:[#allocation10 + $0x18] sm:$0xff] }
 0x1ac   :  { %1734 = vmatpush1.bf16.msra.mxu0 %v1733_v19  ;;  %v536_v19 = vld [vmem:[#allocation7 + $0x3f8] sm:$0xff] }
 0x1ad   :  { %1736 = vmatprep.subr.bf16.mxu0 %v1735_v20  ;;  %v1773_v20 = vpack.c.bf16 %v531_v17, %v529_v16  ;;  %v1775_v21 = vpack.c.bf16 %v536_v19, %v534_v18  ;;  %v786_v16 = vld [vmem:[#allocation10 + $0x10] sm:$0xff]  ;;  %v789_v17 = vld [vmem:[#allocation10 + $0x28] sm:$0xff]  ;;  %v791_v18 = vld [vmem:[#allocation10 + $0x38] sm:$0xff] }
 0x1b0   :  { %1738 = vmatpush1.bf16.msra.mxu0 %v1737_v26  ;;  %v698_v26 = vld [vmem:[#allocation8 + $0x88] sm:$0xff] }
 0x1b1   :  { %1740 = vmatprep.subr.bf16.mxu0 %v1739_v28  ;;  %v1777_v28 = vpack.c.bf16 %v535_v23, %v533_v22  ;;  %v1779_v29 = vpack.c.bf16 %v698_v26, %v697_v24  ;;  %v790_v22 = vld [vmem:[#allocation10 + $0x30] sm:$0xff]  ;;  %v793_v23 = vld [vmem:[#allocation10 + $0x48] sm:$0xff]  ;;  %v795_v24 = vld [vmem:[#allocation10 + $0x58] sm:$0xff] }
 0x1b4   :  { %1742 = vmatpush1.bf16.msra.mxu0 %v1741_v36  ;;  %v407_v36 = vmax.f32 %v2504_v27, 0.0  ;;  %v687_v27 = vld [vmem:[#allocation8 + $0x30] sm:$0xff] }
 0x1b5   :  { %1744 = vmatprep.subr.bf16.mxu0 %v1743_v37  ;;  %v1783_v37 = vpack.c.bf16 %v700_v34, %v699_v33  ;;  %v1793_v54 = vpack.c.bf16 %v688_v51, %v687_v27  ;;  %v799_v33 = vld [vmem:[#allocation10 + $0x78] sm:$0xff]  ;;  %v809_v27 = vld [vmem:[#allocation10 + $0xc8] sm:$0xff] }
 0x1b6   :  { %v811_v51 = vld [vmem:[#allocation10 + $0xd8] sm:$0xff] }
 0x1b8   :  { %1746 = vmatpush1.bf16.msra.mxu0 %v1745_v42  ;;  %v1785_v42 = vpack.c.bf16 %v684_v39, %v683_v38  ;;  %v801_v38 = vld [vmem:[#allocation10 + $0x88] sm:$0xff]  ;;  %v803_v39 = vld [vmem:[#allocation10 + $0x98] sm:$0xff] }
 0x1b9   :  { %1748 = vmatprep.subr.bf16.mxu0 %v1747_v43  ;;  %v1787_v43 = vpack.c.bf16 %v702_v41, %v701_v40  ;;  %v1827_v41 = vpack.c.bf16 %v803_v39, %v801_v38  ;;  %v932_v39 = vld [vmem:[#allocation11 + $0x158] sm:$0xff] }
 0x1bc   :  { %1750 = vmatpush1.bf16.msra.mxu0 %v1749_v48  ;;  %v1789_v48 = vpack.c.bf16 %v686_v45, %v685_v44  ;;  %v805_v44 = vld [vmem:[#allocation10 + $0xa8] sm:$0xff]  ;;  %v807_v45 = vld [vmem:[#allocation10 + $0xb8] sm:$0xff] }
 0x1bd   :  { %1752 = vmatprep.subr.bf16.mxu0 %v1751_v50  ;;  %v1791_v50 = vpack.c.bf16 %v704_v47, %v703_v46  ;;  %v1831_v47 = vpack.c.bf16 %v807_v45, %v805_v44  ;;  %v940_v45 = vld [vmem:[#allocation11 + $0x198] sm:$0xff] }
 0x1c0   :  { %1754 = vmatpush1.bf16.msra.mxu0 %v1753_v56  ;;  %v1795_v56 = vpack.c.bf16 %v706_v53, %v705_v52  ;;  %v1835_v53 = vpack.c.bf16 %v811_v51, %v809_v27  ;;  %v948_v51 = vld [vmem:[#allocation11 + $0x1d8] sm:$0xff] }
 0x1c1   :  { %1756 = vmatprep.subr.bf16.mxu0 %v1755_v57  ;;  %v689_v57 = vld [vmem:[#allocation8 + $0x40] sm:$0xff] }
 0x1c2   :  { %v1797_v61 = vpack.c.bf16 %v690_v58, %v689_v57 }
 0x1c4   :  { %1758 = vmatpush1.bf16.msra.mxu0 %v1757_v62  ;;  %v1799_v62 = vpack.c.bf16 %v708_v60, %v707_v59 }
 0x1c5   :  { %1760 = vmatprep.subr.bf16.mxu0 %v1759_v63  ;;  %v691_v63 = vld [vmem:[#allocation8 + $0x50] sm:$0xff] }
 0x1c6   :  { %v1801_v3 = vpack.c.bf16 %v692_v0, %v691_v63  ;;  %v815_v63 = vld [vmem:[#allocation10 + $0xf8] sm:$0xff] }
 0x1c8   :  { %1762 = vmatpush1.bf16.msra.mxu0 %v1761_v49  ;;  %v1803_v49 = vpack.c.bf16 %v710_v2, %v709_v1  ;;  %v812_v1 = vld [vmem:[#allocation10 + $0xe0] sm:$0xff]  ;;  %v814_v2 = vld [vmem:[#allocation10 + $0xf0] sm:$0xff] }
 0x1c9   :  { %1764 = vmatprep.subr.bf16.mxu0 %v1763_v4  ;;  %v693_v4 = vld [vmem:[#allocation8 + $0x60] sm:$0xff] }
 0x1ca   :  { %v1805_v6 = vpack.c.bf16 %v694_v5, %v693_v4  ;;  %v890_v4 = vld [vmem:[#allocation11 + $0x8] sm:$0xff] }
 0x1cb   :  { %v894_v5 = vld [vmem:[#allocation11 + $0x28] sm:$0xff] }
 0x1cc   :  { %1766 = vmatpush1.bf16.msra.mxu0 %v1765_v55  ;;  %v1807_v55 = vpack.c.bf16 %v712_v8, %v711_v7  ;;  %v1843_v7 = vpack.c.bf16 %v894_v5, %v890_v4  ;;  %v896_v8 = vld [vmem:[#allocation11 + $0x38] sm:$0xff] }
 0x1cd   :  { %1768 = vmatprep.subr.bf16.mxu0 %v1767_v9  ;;  %v695_v9 = vld [vmem:[#allocation8 + $0x70] sm:$0xff]  ;;  %v972_v5 = vld [vmem:[#allocation11 + $0x298] sm:$0xff] }
 0x1ce   :  { %v1809_v11 = vpack.c.bf16 %v696_v10, %v695_v9  ;;  %v891_v9 = vld [vmem:[#allocation11 + $0x10] sm:$0xff] }
 0x1cf   :  { %v895_v10 = vld [vmem:[#allocation11 + $0x30] sm:$0xff] }
 0x1d0   :  { %1770 = vmatpush1.bf16.msra.mxu0 %v1769_v14  ;;  %v784_v14 = vld [vmem:[#allocation10] sm:$0xff] }
 0x1d1   :  { %1772 = vmatprep.subr.bf16.mxu0 %v1771_v15  ;;  %v1811_v15 = vpack.c.bf16 %v787_v13, %v785_v12  ;;  %v1813_v19 = vpack.c.bf16 %v786_v16, %v784_v14  ;;  %v900_v12 = vld [vmem:[#allocation11 + $0x58] sm:$0xff]  ;;  %v903_v16 = vld [vmem:[#allocation11 + $0x70] sm:$0xff] }
 0x1d2   :  { %v904_v13 = vld [vmem:[#allocation11 + $0x78] sm:$0xff] }
 0x1d3   :  { %1812 = vmatprep.subr.bf16.mxu1 %v1811_v15  ;;  %v1911_v14 = vpack.c.bf16 %v904_v13, %v900_v12  ;;  %v899_v15 = vld [vmem:[#allocation11 + $0x50] sm:$0xff] }
 0x1d4   :  { %1774 = vmatpush1.bf16.msra.mxu0 %v1773_v20  ;;  %v1815_v20 = vpack.c.bf16 %v791_v18, %v789_v17  ;;  %1814 = vmatpush1.bf16.msra.mxu1 %v1813_v19  ;;  %v1913_v17 = vpack.c.bf16 %v903_v16, %v899_v15  ;;  %v908_v18 = vld [vmem:[#allocation11 + $0x98] sm:$0xff]  ;;  %v979_v13 = vld [vmem:[#allocation11 + $0x2d0] sm:$0xff] }
 0x1d5   :  { %1776 = vmatprep.subr.bf16.mxu0 %v1775_v21  ;;  %v788_v21 = vld [vmem:[#allocation10 + $0x20] sm:$0xff]  ;;  %v912_v19 = vld [vmem:[#allocation11 + $0xb8] sm:$0xff] }
 0x1d6   :  { %v1817_v26 = vpack.c.bf16 %v790_v22, %v788_v21  ;;  %1816 = vmatprep.subr.bf16.mxu1 %v1815_v20  ;;  %v1915_v20 = vpack.c.bf16 %v912_v19, %v908_v18  ;;  %v907_v21 = vld [vmem:[#allocation11 + $0x90] sm:$0xff]  ;;  %v988_v16 = vld [vmem:[#allocation11 + $0x318] sm:$0xff] }
 0x1d7   :  { %v911_v22 = vld [vmem:[#allocation11 + $0xb0] sm:$0xff] }
 0x1d8   :  { %1778 = vmatpush1.bf16.msra.mxu0 %v1777_v28  ;;  %v1819_v28 = vpack.c.bf16 %v795_v24, %v793_v23  ;;  %1818 = vmatpush1.bf16.msra.mxu1 %v1817_v26  ;;  %v1917_v23 = vpack.c.bf16 %v911_v22, %v907_v21  ;;  %v916_v24 = vld [vmem:[#allocation11 + $0xd8] sm:$0xff]  ;;  %v987_v19 = vld [vmem:[#allocation11 + $0x310] sm:$0xff] }
 0x1d9   :  { %1780 = vmatprep.subr.bf16.mxu0 %v1779_v29  ;;  %v792_v29 = vld [vmem:[#allocation10 + $0x40] sm:$0xff]  ;;  %v920_v26 = vld [vmem:[#allocation11 + $0xf8] sm:$0xff] }
 0x1da   :  { %v1821_v34 = vpack.c.bf16 %v794_v30, %v792_v29  ;;  %1820 = vmatprep.subr.bf16.mxu1 %v1819_v28  ;;  %v1919_v28 = vpack.c.bf16 %v920_v26, %v916_v24  ;;  %v915_v29 = vld [vmem:[#allocation11 + $0xd0] sm:$0xff]  ;;  %v996_v22 = vld [vmem:[#allocation11 + $0x358] sm:$0xff] }
 0x1db   :  { %673 = vmatmul.mubr.f32.vlgmr.msra.gmra.mrb[2].mxu0 %v407_v36  ;;  %v796_v36 = vld [vmem:[#allocation10 + $0x60] sm:$0xff]  ;;  %v919_v30 = vld [vmem:[#allocation11 + $0xf0] sm:$0xff] }
 0x1dc   :  { %1782 = vmatpush3.bf16.msra.mxu0 %v1781_v35  ;;  %v1823_v35 = vpack.c.bf16 %v799_v33, %v797_v31  ;;  %1822 = vmatpush1.bf16.msra.mxu1 %v1821_v34  ;;  %v1921_v31 = vpack.c.bf16 %v919_v30, %v915_v29  ;;  %v924_v33 = vld [vmem:[#allocation11 + $0x118] sm:$0xff]  ;;  %v995_v26 = vld [vmem:[#allocation11 + $0x350] sm:$0xff] }
 0x1dd   :  { %1784 = vmatprep.subr.bf16.mxu0 %v1783_v37  ;;  %v798_v37 = vld [vmem:[#allocation10 + $0x70] sm:$0xff]  ;;  %v928_v34 = vld [vmem:[#allocation11 + $0x138] sm:$0xff] }
 0x1de   :  { %v1825_v40 = vpack.c.bf16 %v798_v37, %v796_v36  ;;  %1824 = vmatprep.subr.bf16.mxu1 %v1823_v35  ;;  %v1923_v35 = vpack.c.bf16 %v928_v34, %v924_v33  ;;  %v923_v36 = vld [vmem:[#allocation11 + $0x110] sm:$0xff]  ;;  %v1004_v30 = vld [vmem:[#allocation11 + $0x398] sm:$0xff] }
 0x1df   :  { %v927_v37 = vld [vmem:[#allocation11 + $0x130] sm:$0xff] }
 0x1e0   :  { %1786 = vmatpush3.bf16.msra.mxu0 %v1785_v42  ;;  %v800_v42 = vld [vmem:[#allocation10 + $0x80] sm:$0xff]  ;;  %1826 = vmatpush1.bf16.msra.mxu1 %v1825_v40  ;;  %v1925_v38 = vpack.c.bf16 %v927_v37, %v923_v36  ;;  %v936_v40 = vld [vmem:[#allocation11 + $0x178] sm:$0xff]  ;;  %v1003_v34 = vld [vmem:[#allocation11 + $0x390] sm:$0xff] }
 0x1e1   :  { %1788 = vmatprep.subr.bf16.mxu0 %v1787_v43  ;;  %v802_v43 = vld [vmem:[#allocation10 + $0x90] sm:$0xff]  ;;  %1828 = vmatprep.subr.bf16.mxu1 %v1827_v41  ;;  %v1927_v41 = vpack.c.bf16 %v936_v40, %v932_v39  ;;  %v889_v37 = vld [vmem:[#allocation11] sm:$0xff]  ;;  %v898_v39 = vld [vmem:[#allocation11 + $0x48] sm:$0xff] }
 0x1e2   :  { %v1829_v46 = vpack.c.bf16 %v802_v43, %v800_v42  ;;  %v931_v42 = vld [vmem:[#allocation11 + $0x150] sm:$0xff]  ;;  %v902_v40 = vld [vmem:[#allocation11 + $0x68] sm:$0xff] }
 0x1e3   :  { %v935_v43 = vld [vmem:[#allocation11 + $0x170] sm:$0xff] }
 0x1e4   :  { %1790 = vmatpush3.bf16.msra.mxu0 %v1789_v48  ;;  %v804_v48 = vld [vmem:[#allocation10 + $0xa0] sm:$0xff]  ;;  %1830 = vmatpush1.bf16.msra.mxu1 %v1829_v46  ;;  %v1929_v44 = vpack.c.bf16 %v935_v43, %v931_v42  ;;  %v944_v46 = vld [vmem:[#allocation11 + $0x1b8] sm:$0xff] }
 0x1e5   :  { %1792 = vmatprep.subr.bf16.mxu0 %v1791_v50  ;;  %v806_v50 = vld [vmem:[#allocation10 + $0xb0] sm:$0xff]  ;;  %1832 = vmatprep.subr.bf16.mxu1 %v1831_v47  ;;  %v1931_v47 = vpack.c.bf16 %v944_v46, %v940_v45  ;;  %v1847_v45 = vpack.c.bf16 %v902_v40, %v898_v39  ;;  %v897_v46 = vld [vmem:[#allocation11 + $0x40] sm:$0xff]  ;;  %v978_v40 = vld [vmem:[#allocation11 + $0x2c8] sm:$0xff] }
 0x1e6   :  { %v1833_v52 = vpack.c.bf16 %v806_v50, %v804_v48  ;;  %v939_v48 = vld [vmem:[#allocation11 + $0x190] sm:$0xff]  ;;  %v973_v39 = vld [vmem:[#allocation11 + $0x2a0] sm:$0xff] }
 0x1e7   :  { %v943_v50 = vld [vmem:[#allocation11 + $0x1b0] sm:$0xff] }
 0x1e8   :  { %1794 = vmatpush3.bf16.msra.mxu0 %v1793_v54  ;;  %v808_v54 = vld [vmem:[#allocation10 + $0xc0] sm:$0xff]  ;;  %1834 = vmatpush1.bf16.msra.mxu1 %v1833_v52  ;;  %v1933_v27 = vpack.c.bf16 %v943_v50, %v939_v48  ;;  %v952_v52 = vld [vmem:[#allocation11 + $0x1f8] sm:$0xff]  ;;  %v906_v48 = vld [vmem:[#allocation11 + $0x88] sm:$0xff] }
 0x1e9   :  { %1796 = vmatprep.subr.bf16.mxu0 %v1795_v56  ;;  %v810_v56 = vld [vmem:[#allocation10 + $0xd0] sm:$0xff]  ;;  %1836 = vmatprep.subr.bf16.mxu1 %v1835_v53  ;;  %v1935_v53 = vpack.c.bf16 %v952_v52, %v948_v51  ;;  %v910_v50 = vld [vmem:[#allocation11 + $0xa8] sm:$0xff]  ;;  %v905_v52 = vld [vmem:[#allocation11 + $0x80] sm:$0xff] }
 0x1ea   :  { %v1837_v57 = vpack.c.bf16 %v810_v56, %v808_v54  ;;  %v947_v54 = vld [vmem:[#allocation11 + $0x1d0] sm:$0xff]  ;;  %v1851_v51 = vpack.c.bf16 %v910_v50, %v906_v48 }
 0x1eb   :  { %v951_v56 = vld [vmem:[#allocation11 + $0x1f0] sm:$0xff] }
 0x1ec   :  { %1798 = vmatpush3.bf16.msra.mxu0 %v1797_v61  ;;  %1838 = vmatpush1.bf16.msra.mxu1 %v1837_v57  ;;  %v1937_v57 = vpack.c.bf16 %v951_v56, %v947_v54  ;;  %v914_v54 = vld [vmem:[#allocation11 + $0xc8] sm:$0xff] }
 0x1ed   :  { %1800 = vmatprep.subr.bf16.mxu0 %v1799_v62  ;;  %v813_v62 = vld [vmem:[#allocation10 + $0xe8] sm:$0xff] }
 0x1ee   :  { %v1839_v0 = vpack.c.bf16 %v815_v63, %v813_v62  ;;  %v959_v62 = vld [vmem:[#allocation11 + $0x230] sm:$0xff]  ;;  %v918_v56 = vld [vmem:[#allocation11 + $0xe8] sm:$0xff] }
 0x1f0   :  { %1802 = vmatpush3.bf16.msra.mxu0 %v1801_v3  ;;  %v1841_v3 = vpack.c.bf16 %v814_v2, %v812_v1  ;;  %1840 = vmatprep.subr.bf16.mxu1 %v1839_v0  ;;  %v964_v0 = vld [vmem:[#allocation11 + $0x258] sm:$0xff] }
 0x1f1   :  { %1804 = vmatprep.subr.bf16.mxu0 %v1803_v49  ;;  %v2343_v49 = vmov 0.0   ;;  %v968_v1 = vld [vmem:[#allocation11 + $0x278] sm:$0xff] }
 0x1f2   :  { %1842 = vmatpush1.bf16.msra.mxu1 %v1841_v3  ;;  %880 = vmatprep.mubr.f32.mxu1 %v2343_v49  ;;  %v1943_v2 = vpack.c.bf16 %v968_v1, %v964_v0  ;;  %v963_v3 = vld [vmem:[#allocation11 + $0x250] sm:$0xff]  ;;  %v921_v1 = vld [vmem:[#allocation11 + $0x100] sm:$0xff] }
 0x1f3   :  { %1844 = vmatprep.subr.bf16.mxu1 %v1843_v7  ;;  %v967_v49 = vld [vmem:[#allocation11 + $0x270] sm:$0xff] }
 0x1f4   :  { %1806 = vmatpush3.bf16.msra.mxu0 %v1805_v6  ;;  %v892_v6 = vld [vmem:[#allocation11 + $0x18] sm:$0xff]  ;;  %v1945_v4 = vpack.c.bf16 %v967_v49, %v963_v3  ;;  %v930_v3 = vld [vmem:[#allocation11 + $0x148] sm:$0xff] }
 0x1f5   :  { %1808 = vmatprep.subr.bf16.mxu0 %v1807_v55  ;;  %v1907_v55 = vpack.c.bf16 %v896_v8, %v892_v6  ;;  %v976_v6 = vld [vmem:[#allocation11 + $0x2b8] sm:$0xff]  ;;  %v971_v8 = vld [vmem:[#allocation11 + $0x290] sm:$0xff]  ;;  %v934_v49 = vld [vmem:[#allocation11 + $0x168] sm:$0xff] }
 0x1f6   :  { %v1947_v7 = vpack.c.bf16 %v976_v6, %v972_v5  ;;  %v1863_v5 = vpack.c.bf16 %v934_v49, %v930_v3  ;;  %v929_v6 = vld [vmem:[#allocation11 + $0x140] sm:$0xff]  ;;  %v1014_v3 = vld [vmem:[#allocation11 + $0x3e8] sm:$0xff]  ;;  %v1012_v49 = vld [vmem:[#allocation11 + $0x3d8] sm:$0xff] }
 0x1f8   :  { %1810 = vmatpush3.bf16.msra.mxu0 %v1809_v11  ;;  %v1909_v11 = vpack.c.bf16 %v895_v10, %v891_v9  ;;  %v980_v10 = vld [vmem:[#allocation11 + $0x2d8] sm:$0xff] }
 0x1f9   :  { %1908 = vmatprep.subr.bf16.mxu0 %v1907_v55  ;;  %v975_v55 = vld [vmem:[#allocation11 + $0x2b0] sm:$0xff] }
 0x1fa   :  { %v1949_v9 = vpack.c.bf16 %v975_v55, %v971_v8  ;;  %v938_v8 = vld [vmem:[#allocation11 + $0x188] sm:$0xff] }
 0x1fb   :  { %v942_v55 = vld [vmem:[#allocation11 + $0x1a8] sm:$0xff] }
 0x2ae   :  { %v674_v58 = vpop.f32.mrb[2].mxu0 }
 0x2af   :  { %v676_v59 = vpop.f32.mrb[3].mxu0  ;;  %v679_v61 = vmax.f32 %v674_v58, 0.0  ;;  %v956_v58 = vld [vmem:[#allocation11 + $0x218] sm:$0xff] }
 0x2b0   :  { %v680_v60 = vmax.f32 %v676_v59, 0.0  ;;  %v960_v59 = vld [vmem:[#allocation11 + $0x238] sm:$0xff] }
 0x2b2   :  { %777 = vmatprep.mubr.f32.mxu0 %v680_v60  ;;  %v1939_v60 = vpack.c.bf16 %v960_v59, %v956_v58  ;;  %v1855_v58 = vpack.c.bf16 %v918_v56, %v914_v54  ;;  %v913_v59 = vld [vmem:[#allocation11 + $0xc0] sm:$0xff] }
 0x2b3   :  { %778 = vmatmul.mubr.f32.vlgmr.msra.gmra.mrb[4].mxu0 %v679_v61  ;;  %v955_v61 = vld [vmem:[#allocation11 + $0x210] sm:$0xff] }
 0x2b4   :  { %1910 = vmatpush1.bf16.msra.mxu0 %v1909_v11  ;;  %v1941_v63 = vpack.c.bf16 %v959_v62, %v955_v61  ;;  %v984_v11 = vld [vmem:[#allocation11 + $0x2f8] sm:$0xff]  ;;  %v922_v61 = vld [vmem:[#allocation11 + $0x108] sm:$0xff] }
 0x2b5   :  { %1912 = vmatprep.subr.bf16.mxu0 %v1911_v14  ;;  %v1951_v12 = vpack.c.bf16 %v984_v11, %v980_v10  ;;  %v983_v14 = vld [vmem:[#allocation11 + $0x2f0] sm:$0xff]  ;;  %v926_v62 = vld [vmem:[#allocation11 + $0x128] sm:$0xff]  ;;  %v1867_v10 = vpack.c.bf16 %v942_v55, %v938_v8  ;;  %v937_v11 = vld [vmem:[#allocation11 + $0x180] sm:$0xff] }
 0x2b6   :  { %v1953_v15 = vpack.c.bf16 %v983_v14, %v979_v13  ;;  %v1859_v0 = vpack.c.bf16 %v926_v62, %v922_v61  ;;  %v946_v13 = vld [vmem:[#allocation11 + $0x1c8] sm:$0xff] }
 0x2b7   :  { %v950_v14 = vld [vmem:[#allocation11 + $0x1e8] sm:$0xff] }
 0x2b8   :  { %1914 = vmatpush1.bf16.msra.mxu0 %v1913_v17  ;;  %v992_v17 = vld [vmem:[#allocation11 + $0x338] sm:$0xff] }
 0x2b9   :  { %1916 = vmatprep.subr.bf16.mxu0 %v1915_v20  ;;  %v1955_v18 = vpack.c.bf16 %v992_v17, %v988_v16  ;;  %v991_v20 = vld [vmem:[#allocation11 + $0x330] sm:$0xff]  ;;  %v1871_v16 = vpack.c.bf16 %v950_v14, %v946_v13  ;;  %v945_v17 = vld [vmem:[#allocation11 + $0x1c0] sm:$0xff]  ;;  %v1166_v13 = vld [vmem:[#allocation13 + $0x18] sm:$0xff] }
 0x2ba   :  { %v1957_v21 = vpack.c.bf16 %v991_v20, %v987_v19  ;;  %v954_v19 = vld [vmem:[#allocation11 + $0x208] sm:$0xff] }
 0x2bb   :  { %v958_v20 = vld [vmem:[#allocation11 + $0x228] sm:$0xff] }
 0x2bc   :  { %1918 = vmatpush1.bf16.msra.mxu0 %v1917_v23  ;;  %v1000_v23 = vld [vmem:[#allocation11 + $0x378] sm:$0xff] }
 0x2bd   :  { %1920 = vmatprep.subr.bf16.mxu0 %v1919_v28  ;;  %v1959_v24 = vpack.c.bf16 %v1000_v23, %v996_v22  ;;  %v999_v28 = vld [vmem:[#allocation11 + $0x370] sm:$0xff]  ;;  %v1875_v22 = vpack.c.bf16 %v958_v20, %v954_v19  ;;  %v953_v23 = vld [vmem:[#allocation11 + $0x200] sm:$0xff]  ;;  %v1170_v19 = vld [vmem:[#allocation13 + $0x38] sm:$0xff] }
 0x2be   :  { %v1961_v29 = vpack.c.bf16 %v999_v28, %v995_v26  ;;  %v962_v26 = vld [vmem:[#allocation11 + $0x248] sm:$0xff] }
 0x2bf   :  { %v966_v28 = vld [vmem:[#allocation11 + $0x268] sm:$0xff] }
 0x2c0   :  { %1922 = vmatpush1.bf16.msra.mxu0 %v1921_v31  ;;  %v1008_v31 = vld [vmem:[#allocation11 + $0x3b8] sm:$0xff] }
 0x2c1   :  { %1924 = vmatprep.subr.bf16.mxu0 %v1923_v35  ;;  %v1963_v33 = vpack.c.bf16 %v1008_v31, %v1004_v30  ;;  %v1007_v35 = vld [vmem:[#allocation11 + $0x3b0] sm:$0xff]  ;;  %v1879_v30 = vpack.c.bf16 %v966_v28, %v962_v26  ;;  %v961_v31 = vld [vmem:[#allocation11 + $0x240] sm:$0xff] }
 0x2c2   :  { %v1965_v36 = vpack.c.bf16 %v1007_v35, %v1003_v34  ;;  %v970_v34 = vld [vmem:[#allocation11 + $0x288] sm:$0xff]  ;;  %v1167_v26 = vld [vmem:[#allocation13 + $0x20] sm:$0xff]  ;;  %v1169_v28 = vld [vmem:[#allocation13 + $0x30] sm:$0xff] }
 0x2c3   :  { %v974_v35 = vld [vmem:[#allocation11 + $0x2a8] sm:$0xff] }
 0x2c4   :  { %1926 = vmatpush1.bf16.msra.mxu0 %v1925_v38  ;;  %v893_v38 = vld [vmem:[#allocation11 + $0x20] sm:$0xff] }
 0x2c5   :  { %1928 = vmatprep.subr.bf16.mxu0 %v1927_v41  ;;  %v1845_v43 = vpack.c.bf16 %v893_v38, %v889_v37  ;;  %v1883_v37 = vpack.c.bf16 %v974_v35, %v970_v34  ;;  %v969_v38 = vld [vmem:[#allocation11 + $0x280] sm:$0xff]  ;;  %v1173_v35 = vld [vmem:[#allocation13 + $0x50] sm:$0xff] }
 0x2c6   :  { %v1171_v34 = vld [vmem:[#allocation13 + $0x40] sm:$0xff] }
 0x2c8   :  { %1930 = vmatpush1.bf16.msra.mxu0 %v1929_v44 }
 0x2c9   :  { %1932 = vmatprep.subr.bf16.mxu0 %v1931_v47  ;;  %v901_v47 = vld [vmem:[#allocation11 + $0x60] sm:$0xff] }
 0x2cc   :  { %1934 = vmatpush1.bf16.msra.mxu0 %v1933_v27  ;;  %v1849_v27 = vpack.c.bf16 %v901_v47, %v897_v46  ;;  %v986_v46 = vld [vmem:[#allocation11 + $0x308] sm:$0xff] }
 0x2cd   :  { %1936 = vmatprep.subr.bf16.mxu0 %v1935_v53  ;;  %v909_v53 = vld [vmem:[#allocation11 + $0xa0] sm:$0xff]  ;;  %v990_v47 = vld [vmem:[#allocation11 + $0x328] sm:$0xff] }
 0x2ce   :  { %v1891_v50 = vpack.c.bf16 %v990_v47, %v986_v46  ;;  %v1179_v46 = vld [vmem:[#allocation13 + $0x80] sm:$0xff]  ;;  %v1181_v47 = vld [vmem:[#allocation13 + $0x90] sm:$0xff] }
 0x2d0   :  { %1938 = vmatpush1.bf16.msra.mxu0 %v1937_v57  ;;  %v1853_v57 = vpack.c.bf16 %v909_v53, %v905_v52  ;;  %v994_v52 = vld [vmem:[#allocation11 + $0x348] sm:$0xff] }
 0x2d1   :  { %1940 = vmatprep.subr.bf16.mxu0 %v1939_v60  ;;  %v917_v60 = vld [vmem:[#allocation11 + $0xe0] sm:$0xff]  ;;  %v998_v53 = vld [vmem:[#allocation11 + $0x368] sm:$0xff] }
 0x2d2   :  { %v1895_v56 = vpack.c.bf16 %v998_v53, %v994_v52  ;;  %v1183_v52 = vld [vmem:[#allocation13 + $0xa0] sm:$0xff]  ;;  %v1185_v53 = vld [vmem:[#allocation13 + $0xb0] sm:$0xff] }
 0x2d4   :  { %1942 = vmatpush1.bf16.msra.mxu0 %v1941_v63  ;;  %v1857_v63 = vpack.c.bf16 %v917_v60, %v913_v59  ;;  %v1002_v59 = vld [vmem:[#allocation11 + $0x388] sm:$0xff] }
 0x2d5   :  { %1944 = vmatprep.subr.bf16.mxu0 %v1943_v2  ;;  %v925_v2 = vld [vmem:[#allocation11 + $0x120] sm:$0xff]  ;;  %v1006_v60 = vld [vmem:[#allocation11 + $0x3a8] sm:$0xff] }
 0x2d6   :  { %v1899_v62 = vpack.c.bf16 %v1006_v60, %v1002_v59  ;;  %v1187_v59 = vld [vmem:[#allocation13 + $0xc0] sm:$0xff]  ;;  %v1189_v60 = vld [vmem:[#allocation13 + $0xd0] sm:$0xff] }
 0x2d8   :  { %1946 = vmatpush1.bf16.msra.mxu0 %v1945_v4  ;;  %v1861_v4 = vpack.c.bf16 %v925_v2, %v921_v1  ;;  %v1010_v2 = vld [vmem:[#allocation11 + $0x3c8] sm:$0xff] }
 0x2d9   :  { %1948 = vmatprep.subr.bf16.mxu0 %v1947_v7  ;;  %v933_v7 = vld [vmem:[#allocation11 + $0x160] sm:$0xff] }
 0x2dc   :  { %1950 = vmatpush1.bf16.msra.mxu0 %v1949_v9  ;;  %v1865_v9 = vpack.c.bf16 %v933_v7, %v929_v6  ;;  %v1009_v6 = vld [vmem:[#allocation11 + $0x3c0] sm:$0xff] }
 0x2dd   :  { %1952 = vmatprep.subr.bf16.mxu0 %v1951_v12  ;;  %v941_v12 = vld [vmem:[#allocation11 + $0x1a0] sm:$0xff] }
 0x2de   :  { %v1013_v7 = vld [vmem:[#allocation11 + $0x3e0] sm:$0xff] }
 0x2df   :  { %v1905_v55 = vpack.c.bf16 %v1013_v7, %v1009_v6  ;;  %v1195_v6 = vld [vmem:[#allocation13 + $0x100] sm:$0xff]  ;;  %v1197_v7 = vld [vmem:[#allocation13 + $0x110] sm:$0xff] }
 0x2e0   :  { %1954 = vmatpush1.bf16.msra.mxu0 %v1953_v15  ;;  %v1869_v15 = vpack.c.bf16 %v941_v12, %v937_v11  ;;  %v1164_v12 = vld [vmem:[#allocation13 + $0x8] sm:$0xff] }
 0x2e1   :  { %1956 = vmatprep.subr.bf16.mxu0 %v1955_v18  ;;  %v949_v18 = vld [vmem:[#allocation11 + $0x1e0] sm:$0xff]  ;;  %v1971_v14 = vpack.c.bf16 %v1166_v13, %v1164_v12  ;;  %v1201_v12 = vld [vmem:[#allocation13 + $0x130] sm:$0xff]  ;;  %v1204_v13 = vld [vmem:[#allocation13 + $0x148] sm:$0xff] }
 0x2e4   :  { %1958 = vmatpush1.bf16.msra.mxu0 %v1957_v21  ;;  %v1873_v21 = vpack.c.bf16 %v949_v18, %v945_v17  ;;  %v1168_v18 = vld [vmem:[#allocation13 + $0x28] sm:$0xff] }
 0x2e5   :  { %1960 = vmatprep.subr.bf16.mxu0 %v1959_v24  ;;  %v957_v24 = vld [vmem:[#allocation11 + $0x220] sm:$0xff] }
 0x2e8   :  { %1962 = vmatpush1.bf16.msra.mxu0 %v1961_v29  ;;  %v1877_v29 = vpack.c.bf16 %v957_v24, %v953_v23  ;;  %v1975_v24 = vpack.c.bf16 %v1170_v19, %v1168_v18  ;;  %v1205_v18 = vld [vmem:[#allocation13 + $0x150] sm:$0xff]  ;;  %v1208_v19 = vld [vmem:[#allocation13 + $0x168] sm:$0xff] }
 0x2e9   :  { %1964 = vmatprep.subr.bf16.mxu0 %v1963_v33  ;;  %v965_v33 = vld [vmem:[#allocation11 + $0x260] sm:$0xff] }
 0x2ec   :  { %1966 = vmatpush1.bf16.msra.mxu0 %v1965_v36  ;;  %v1881_v36 = vpack.c.bf16 %v965_v33, %v961_v31  ;;  %v1977_v31 = vpack.c.bf16 %v1169_v28, %v1167_v26  ;;  %v1212_v26 = vld [vmem:[#allocation13 + $0x188] sm:$0xff]  ;;  %v1214_v28 = vld [vmem:[#allocation13 + $0x198] sm:$0xff] }
 0x386   :  { %v1520_v41 = vpop.f32.mrb[4].mxu0 }
 0x387   :  { %v1521_v42 = vpop.f32.mrb[5].mxu0 }
 0x388   :  { %v1522_v44 = vadd.f32 %v1521_v42, %v1520_v41  ;;  %v982_v41 = vld [vmem:[#allocation11 + $0x2e8] sm:$0xff]  ;;  %v1885_v42 = vpack.c.bf16 %v973_v39, %v969_v38  ;;  %v1981_v38 = vpack.c.bf16 %v1173_v35, %v1171_v34  ;;  %v1218_v35 = vld [vmem:[#allocation13 + $0x1b8] sm:$0xff] }
 0x389   :  { %v1216_v34 = vld [vmem:[#allocation13 + $0x1a8] sm:$0xff] }
 0x38a   :  { %783 = vst [vmem:[#allocation15] sm:$0x1] %v1522_v44  ;;  %881 = vmatmul.mubr.f32.vlgmr.msra.gmra.mrb[2].mxu1 %v1522_v44  ;;  %v977_v44 = vld [vmem:[#allocation11 + $0x2c0] sm:$0xff] }
 0x38b   :  { %1846 = vmatpush1.bf16.msra.mxu1 %v1845_v43  ;;  %v1887_v43 = vpack.c.bf16 %v982_v41, %v978_v40  ;;  %v1175_v40 = vld [vmem:[#allocation13 + $0x60] sm:$0xff]  ;;  %v1177_v41 = vld [vmem:[#allocation13 + $0x70] sm:$0xff] }
 0x38c   :  { %1848 = vmatprep.subr.bf16.mxu1 %v1847_v45  ;;  %v981_v45 = vld [vmem:[#allocation11 + $0x2e0] sm:$0xff] }
 0x38d   :  { %v1889_v48 = vpack.c.bf16 %v981_v45, %v977_v44  ;;  %v1985_v44 = vpack.c.bf16 %v1177_v41, %v1175_v40  ;;  %v1220_v40 = vld [vmem:[#allocation13 + $0x1c8] sm:$0xff]  ;;  %v1222_v41 = vld [vmem:[#allocation13 + $0x1d8] sm:$0xff] }
 0x38f   :  { %1850 = vmatpush1.bf16.msra.mxu1 %v1849_v27  ;;  %v985_v27 = vld [vmem:[#allocation11 + $0x300] sm:$0xff] }
 0x390   :  { %1852 = vmatprep.subr.bf16.mxu1 %v1851_v51  ;;  %v989_v51 = vld [vmem:[#allocation11 + $0x320] sm:$0xff] }
 0x391   :  { %v1893_v54 = vpack.c.bf16 %v989_v51, %v985_v27  ;;  %v1989_v27 = vpack.c.bf16 %v1181_v47, %v1179_v46  ;;  %v1224_v47 = vld [vmem:[#allocation13 + $0x1e8] sm:$0xff] }
 0x393   :  { %1854 = vmatpush1.bf16.msra.mxu1 %v1853_v57  ;;  %v993_v57 = vld [vmem:[#allocation11 + $0x340] sm:$0xff] }
 0x394   :  { %1856 = vmatprep.subr.bf16.mxu1 %v1855_v58  ;;  %v997_v58 = vld [vmem:[#allocation11 + $0x360] sm:$0xff] }
 0x395   :  { %v1897_v61 = vpack.c.bf16 %v997_v58, %v993_v57  ;;  %v1993_v57 = vpack.c.bf16 %v1185_v53, %v1183_v52  ;;  %v1228_v53 = vld [vmem:[#allocation13 + $0x208] sm:$0xff] }
 0x397   :  { %1858 = vmatpush1.bf16.msra.mxu1 %v1857_v63  ;;  %v1001_v63 = vld [vmem:[#allocation11 + $0x380] sm:$0xff] }
 0x398   :  { %1860 = vmatprep.subr.bf16.mxu1 %v1859_v0  ;;  %v1005_v0 = vld [vmem:[#allocation11 + $0x3a0] sm:$0xff] }
 0x399   :  { %v1901_v1 = vpack.c.bf16 %v1005_v0, %v1001_v63  ;;  %v1997_v63 = vpack.c.bf16 %v1189_v60, %v1187_v59 }
 0x39b   :  { %1862 = vmatpush1.bf16.msra.mxu1 %v1861_v4  ;;  %v1903_v4 = vpack.c.bf16 %v1014_v3, %v1010_v2  ;;  %v1193_v2 = vld [vmem:[#allocation13 + $0xf0] sm:$0xff]  ;;  %v1196_v3 = vld [vmem:[#allocation13 + $0x108] sm:$0xff] }
 0x39c   :  { %1864 = vmatprep.subr.bf16.mxu1 %v1863_v5  ;;  %v1016_v5 = vld [vmem:[#allocation11 + $0x3f8] sm:$0xff] }
 0x39d   :  { %v1967_v8 = vpack.c.bf16 %v1016_v5, %v1012_v49  ;;  %v1198_v49 = vld [vmem:[#allocation13 + $0x118] sm:$0xff] }
 0x39e   :  { %v2003_v5 = vpack.c.bf16 %v1198_v49, %v1196_v3 }
 0x39f   :  { %1866 = vmatpush1.bf16.msra.mxu1 %v1865_v9  ;;  %v1011_v9 = vld [vmem:[#allocation11 + $0x3d0] sm:$0xff]  ;;  %1968 = vmatprep.subr.bf16.mxu0 %v1967_v8  ;;  %v1200_v8 = vld [vmem:[#allocation13 + $0x128] sm:$0xff] }
 0x3a0   :  { %1868 = vmatprep.subr.bf16.mxu1 %v1867_v10  ;;  %v1015_v10 = vld [vmem:[#allocation11 + $0x3f0] sm:$0xff] }
 0x3a1   :  { %v1969_v11 = vpack.c.bf16 %v1015_v10, %v1011_v9  ;;  %v2005_v9 = vpack.c.bf16 %v1197_v7, %v1195_v6  ;;  %v1236_v7 = vld [vmem:[#allocation13 + $0x248] sm:$0xff] }
 0x3a3   :  { %1870 = vmatpush1.bf16.msra.mxu1 %v1869_v15  ;;  %1970 = vmatpush1.bf16.msra.mxu0 %v1969_v11  ;;  %v1163_v15 = vld [vmem:[#allocation13] sm:$0xff] }
 0x3a4   :  { %1872 = vmatprep.subr.bf16.mxu1 %v1871_v16  ;;  %v1165_v16 = vld [vmem:[#allocation13 + $0x10] sm:$0xff]  ;;  %v1199_v11 = vld [vmem:[#allocation13 + $0x120] sm:$0xff] }
 0x3a7   :  { %1874 = vmatpush1.bf16.msra.mxu1 %v1873_v21 }
 0x3a8   :  { %1876 = vmatprep.subr.bf16.mxu1 %v1875_v22  ;;  %v1973_v22 = vpack.c.bf16 %v1165_v16, %v1163_v15  ;;  %v2009_v15 = vpack.c.bf16 %v1201_v12, %v1199_v11  ;;  %v1237_v11 = vld [vmem:[#allocation13 + $0x250] sm:$0xff]  ;;  %v1240_v12 = vld [vmem:[#allocation13 + $0x268] sm:$0xff] }
 0x3ab   :  { %1878 = vmatpush1.bf16.msra.mxu1 %v1877_v29  ;;  %v1172_v29 = vld [vmem:[#allocation13 + $0x48] sm:$0xff] }
 0x3ac   :  { %1880 = vmatprep.subr.bf16.mxu1 %v1879_v30  ;;  %v1174_v30 = vld [vmem:[#allocation13 + $0x58] sm:$0xff] }
 0x3ad   :  { %v1979_v33 = vpack.c.bf16 %v1174_v30, %v1172_v29  ;;  %v2019_v30 = vpack.c.bf16 %v1214_v28, %v1212_v26  ;;  %v1250_v26 = vld [vmem:[#allocation13 + $0x2b8] sm:$0xff] }
 0x3af   :  { %1882 = vmatpush1.bf16.msra.mxu1 %v1881_v36  ;;  %v1176_v36 = vld [vmem:[#allocation13 + $0x68] sm:$0xff] }
 0x3b0   :  { %1884 = vmatprep.subr.bf16.mxu1 %v1883_v37  ;;  %v1178_v37 = vld [vmem:[#allocation13 + $0x78] sm:$0xff] }
 0x3b1   :  { %v1983_v39 = vpack.c.bf16 %v1178_v37, %v1176_v36  ;;  %v2023_v37 = vpack.c.bf16 %v1218_v35, %v1216_v34  ;;  %v1254_v34 = vld [vmem:[#allocation13 + $0x2d8] sm:$0xff] }
 0x3b3   :  { %1886 = vmatpush1.bf16.msra.mxu1 %v1885_v42  ;;  %v1180_v42 = vld [vmem:[#allocation13 + $0x88] sm:$0xff] }
 0x3b4   :  { %1888 = vmatprep.subr.bf16.mxu1 %v1887_v43  ;;  %v1182_v43 = vld [vmem:[#allocation13 + $0x98] sm:$0xff] }
 0x3b5   :  { %v1987_v45 = vpack.c.bf16 %v1182_v43, %v1180_v42  ;;  %v2027_v43 = vpack.c.bf16 %v1222_v41, %v1220_v40  ;;  %v1258_v40 = vld [vmem:[#allocation13 + $0x2f8] sm:$0xff] }
 0x3b7   :  { %1890 = vmatpush1.bf16.msra.mxu1 %v1889_v48  ;;  %v1184_v48 = vld [vmem:[#allocation13 + $0xa8] sm:$0xff] }
 0x3b8   :  { %1892 = vmatprep.subr.bf16.mxu1 %v1891_v50  ;;  %v1186_v50 = vld [vmem:[#allocation13 + $0xb8] sm:$0xff] }
 0x3b9   :  { %v1991_v51 = vpack.c.bf16 %v1186_v50, %v1184_v48  ;;  %v1226_v48 = vld [vmem:[#allocation13 + $0x1f8] sm:$0xff] }
 0x3ba   :  { %v2031_v50 = vpack.c.bf16 %v1226_v48, %v1224_v47 }
 0x3bb   :  { %1894 = vmatpush1.bf16.msra.mxu1 %v1893_v54  ;;  %v1188_v54 = vld [vmem:[#allocation13 + $0xc8] sm:$0xff] }
 0x3bc   :  { %1896 = vmatprep.subr.bf16.mxu1 %v1895_v56  ;;  %v1190_v56 = vld [vmem:[#allocation13 + $0xd8] sm:$0xff] }
 0x3bd   :  { %v1995_v58 = vpack.c.bf16 %v1190_v56, %v1188_v54  ;;  %v1230_v54 = vld [vmem:[#allocation13 + $0x218] sm:$0xff] }
 0x3be   :  { %v2035_v56 = vpack.c.bf16 %v1230_v54, %v1228_v53 }
 0x3bf   :  { %1898 = vmatpush1.bf16.msra.mxu1 %v1897_v61  ;;  %v1192_v61 = vld [vmem:[#allocation13 + $0xe8] sm:$0xff] }
 0x3c0   :  { %1900 = vmatprep.subr.bf16.mxu1 %v1899_v62  ;;  %v1194_v62 = vld [vmem:[#allocation13 + $0xf8] sm:$0xff] }
 0x3c1   :  { %v1999_v0 = vpack.c.bf16 %v1194_v62, %v1192_v61  ;;  %v1232_v61 = vld [vmem:[#allocation13 + $0x228] sm:$0xff]  ;;  %v1234_v62 = vld [vmem:[#allocation13 + $0x238] sm:$0xff] }
 0x3c2   :  { %v2039_v49 = vpack.c.bf16 %v1234_v62, %v1232_v61 }
 0x3c3   :  { %1902 = vmatpush1.bf16.msra.mxu1 %v1901_v1  ;;  %v1191_v1 = vld [vmem:[#allocation13 + $0xe0] sm:$0xff] }
 0x3c4   :  { %1904 = vmatprep.subr.bf16.mxu1 %v1903_v4  ;;  %v2001_v4 = vpack.c.bf16 %v1193_v2, %v1191_v1 }
 0x3c7   :  { %1906 = vmatpush1.bf16.msra.mxu1 %v1905_v55  ;;  %v1202_v55 = vld [vmem:[#allocation13 + $0x138] sm:$0xff] }
 0x3c8   :  { %1972 = vmatprep.subr.bf16.mxu1 %v1971_v14  ;;  %v2007_v10 = vpack.c.bf16 %v1202_v55, %v1200_v8  ;;  %v1206_v14 = vld [vmem:[#allocation13 + $0x158] sm:$0xff] }
 0x3c9   :  { %v2011_v16 = vpack.c.bf16 %v1206_v14, %v1204_v13  ;;  %v1238_v8 = vld [vmem:[#allocation13 + $0x258] sm:$0xff] }
 0x3ca   :  { %v1242_v13 = vld [vmem:[#allocation13 + $0x278] sm:$0xff] }
 0x45d   :  { %v882_v17 = vpop.f32.mrb[2].mxu1 }
 0x45e   :  { %v884_v20 = vpop.f32.mrb[3].mxu1  ;;  %v887_v23 = vmax.f32 %v882_v17, 0.0  ;;  %v1203_v17 = vld [vmem:[#allocation13 + $0x140] sm:$0xff] }
 0x45f   :  { %v888_v21 = vmax.f32 %v884_v20, 0.0  ;;  %v1210_v20 = vld [vmem:[#allocation13 + $0x178] sm:$0xff] }
 0x461   :  { %1081 = vmatprep.mubr.f32.mxu1 %v888_v21  ;;  %1152 = vmatprep.mubr.f32.mxu0 %v888_v21  ;;  %v2013_v21 = vpack.c.bf16 %v1205_v18, %v1203_v17  ;;  %v1241_v17 = vld [vmem:[#allocation13 + $0x270] sm:$0xff]  ;;  %v1244_v18 = vld [vmem:[#allocation13 + $0x288] sm:$0xff] }
 0x462   :  { %1082 = vmatmul.mubr.f32.vlgmr.msra.gmra.mrb[4].mxu1 %v887_v23  ;;  %1153 = vmatmul.mubr.f32.vlgmr.msra.gmra.mrb[6].mxu0 %v887_v23  ;;  %v1207_v23 = vld [vmem:[#allocation13 + $0x160] sm:$0xff] }
 0x463   :  { %1974 = vmatpush1.bf16.msra.mxu1 %v1973_v22  ;;  %v2015_v22 = vpack.c.bf16 %v1210_v20, %v1208_v19  ;;  %v1246_v19 = vld [vmem:[#allocation13 + $0x298] sm:$0xff] }
 0x464   :  { %1976 = vmatprep.subr.bf16.mxu1 %v1975_v24  ;;  %v1209_v24 = vld [vmem:[#allocation13 + $0x170] sm:$0xff] }
 0x465   :  { %v2017_v29 = vpack.c.bf16 %v1209_v24, %v1207_v23  ;;  %v1245_v23 = vld [vmem:[#allocation13 + $0x290] sm:$0xff]  ;;  %v1248_v24 = vld [vmem:[#allocation13 + $0x2a8] sm:$0xff] }
 0x467   :  { %1978 = vmatpush1.bf16.msra.mxu1 %v1977_v31  ;;  %v1211_v31 = vld [vmem:[#allocation13 + $0x180] sm:$0xff] }
 0x468   :  { %1980 = vmatprep.subr.bf16.mxu1 %v1979_v33  ;;  %v1213_v33 = vld [vmem:[#allocation13 + $0x190] sm:$0xff] }
 0x469   :  { %v2021_v36 = vpack.c.bf16 %v1213_v33, %v1211_v31  ;;  %v1249_v31 = vld [vmem:[#allocation13 + $0x2b0] sm:$0xff]  ;;  %v1252_v33 = vld [vmem:[#allocation13 + $0x2c8] sm:$0xff] }
 0x46b   :  { %1982 = vmatpush1.bf16.msra.mxu1 %v1981_v38  ;;  %v1215_v38 = vld [vmem:[#allocation13 + $0x1a0] sm:$0xff] }
 0x46c   :  { %1984 = vmatprep.subr.bf16.mxu1 %v1983_v39  ;;  %v1217_v39 = vld [vmem:[#allocation13 + $0x1b0] sm:$0xff] }
 0x46d   :  { %v2025_v42 = vpack.c.bf16 %v1217_v39, %v1215_v38  ;;  %v1253_v38 = vld [vmem:[#allocation13 + $0x2d0] sm:$0xff]  ;;  %v1256_v39 = vld [vmem:[#allocation13 + $0x2e8] sm:$0xff] }
 0x46f   :  { %1986 = vmatpush1.bf16.msra.mxu1 %v1985_v44  ;;  %v1219_v44 = vld [vmem:[#allocation13 + $0x1c0] sm:$0xff] }
 0x470   :  { %1988 = vmatprep.subr.bf16.mxu1 %v1987_v45  ;;  %v1221_v45 = vld [vmem:[#allocation13 + $0x1d0] sm:$0xff] }
 0x471   :  { %v2029_v46 = vpack.c.bf16 %v1221_v45, %v1219_v44  ;;  %v1257_v44 = vld [vmem:[#allocation13 + $0x2f0] sm:$0xff]  ;;  %v1260_v45 = vld [vmem:[#allocation13 + $0x308] sm:$0xff] }
 0x473   :  { %1990 = vmatpush1.bf16.msra.mxu1 %v1989_v27  ;;  %v1223_v27 = vld [vmem:[#allocation13 + $0x1e0] sm:$0xff] }
 0x474   :  { %1992 = vmatprep.subr.bf16.mxu1 %v1991_v51  ;;  %v1225_v51 = vld [vmem:[#allocation13 + $0x1f0] sm:$0xff] }
 0x475   :  { %v2033_v52 = vpack.c.bf16 %v1225_v51, %v1223_v27  ;;  %v1261_v27 = vld [vmem:[#allocation13 + $0x310] sm:$0xff]  ;;  %v1264_v51 = vld [vmem:[#allocation13 + $0x328] sm:$0xff] }
 0x477   :  { %1994 = vmatpush1.bf16.msra.mxu1 %v1993_v57  ;;  %v1227_v57 = vld [vmem:[#allocation13 + $0x200] sm:$0xff] }
 0x478   :  { %1996 = vmatprep.subr.bf16.mxu1 %v1995_v58  ;;  %v1229_v58 = vld [vmem:[#allocation13 + $0x210] sm:$0xff] }
 0x479   :  { %v2037_v2 = vpack.c.bf16 %v1229_v58, %v1227_v57  ;;  %v1265_v57 = vld [vmem:[#allocation13 + $0x330] sm:$0xff]  ;;  %v1268_v58 = vld [vmem:[#allocation13 + $0x348] sm:$0xff] }
 0x47b   :  { %1998 = vmatpush1.bf16.msra.mxu1 %v1997_v63 }
 0x47c   :  { %2000 = vmatprep.subr.bf16.mxu1 %v1999_v0 }
 0x47f   :  { %2002 = vmatpush1.bf16.msra.mxu1 %v2001_v4  ;;  %v1231_v4 = vld [vmem:[#allocation13 + $0x220] sm:$0xff] }
 0x480   :  { %2004 = vmatprep.subr.bf16.mxu1 %v2003_v5  ;;  %v1233_v5 = vld [vmem:[#allocation13 + $0x230] sm:$0xff] }
 0x481   :  { %v2041_v55 = vpack.c.bf16 %v1233_v5, %v1231_v4  ;;  %v1271_v4 = vld [vmem:[#allocation13 + $0x360] sm:$0xff]  ;;  %v1273_v5 = vld [vmem:[#allocation13 + $0x370] sm:$0xff] }
 0x483   :  { %2006 = vmatpush1.bf16.msra.mxu1 %v2005_v9  ;;  %v2043_v9 = vpack.c.bf16 %v1238_v8, %v1236_v7  ;;  %v1278_v7 = vld [vmem:[#allocation13 + $0x398] sm:$0xff]  ;;  %v2081_v8 = vpack.c.bf16 %v1273_v5, %v1271_v4 }
 0x484   :  { %2008 = vmatprep.subr.bf16.mxu1 %v2007_v10  ;;  %v1235_v10 = vld [vmem:[#allocation13 + $0x240] sm:$0xff] }
 0x485   :  { %v2045_v14 = vpack.c.bf16 %v1237_v11, %v1235_v10  ;;  %v1277_v10 = vld [vmem:[#allocation13 + $0x390] sm:$0xff]  ;;  %v1280_v11 = vld [vmem:[#allocation13 + $0x3a8] sm:$0xff] }
 0x487   :  { %2010 = vmatpush1.bf16.msra.mxu1 %v2009_v15  ;;  %v2047_v15 = vpack.c.bf16 %v1242_v13, %v1240_v12  ;;  %v1282_v12 = vld [vmem:[#allocation13 + $0x3b8] sm:$0xff] }
 0x488   :  { %2012 = vmatprep.subr.bf16.mxu1 %v2011_v16  ;;  %v1239_v16 = vld [vmem:[#allocation13 + $0x260] sm:$0xff] }
 0x489   :  { %v2049_v20 = vpack.c.bf16 %v1241_v17, %v1239_v16  ;;  %v1281_v16 = vld [vmem:[#allocation13 + $0x3b0] sm:$0xff]  ;;  %v1284_v17 = vld [vmem:[#allocation13 + $0x3c8] sm:$0xff] }
 0x48b   :  { %2014 = vmatpush1.bf16.msra.mxu1 %v2013_v21  ;;  %v2051_v21 = vpack.c.bf16 %v1246_v19, %v1244_v18  ;;  %v1286_v18 = vld [vmem:[#allocation13 + $0x3d8] sm:$0xff] }
 0x48c   :  { %2016 = vmatprep.subr.bf16.mxu1 %v2015_v22  ;;  %v1243_v22 = vld [vmem:[#allocation13 + $0x280] sm:$0xff] }
 0x48d   :  { %v2053_v28 = vpack.c.bf16 %v1245_v23, %v1243_v22  ;;  %v1285_v22 = vld [vmem:[#allocation13 + $0x3d0] sm:$0xff]  ;;  %v1288_v23 = vld [vmem:[#allocation13 + $0x3e8] sm:$0xff] }
 0x48f   :  { %2018 = vmatpush1.bf16.msra.mxu1 %v2017_v29  ;;  %v2055_v29 = vpack.c.bf16 %v1250_v26, %v1248_v24  ;;  %v1290_v24 = vld [vmem:[#allocation13 + $0x3f8] sm:$0xff] }
 0x490   :  { %2020 = vmatprep.subr.bf16.mxu1 %v2019_v30  ;;  %v1247_v30 = vld [vmem:[#allocation13 + $0x2a0] sm:$0xff] }
 0x491   :  { %v2057_v35 = vpack.c.bf16 %v1249_v31, %v1247_v30  ;;  %v1289_v30 = vld [vmem:[#allocation13 + $0x3f0] sm:$0xff] }
 0x493   :  { %2022 = vmatpush1.bf16.msra.mxu1 %v2021_v36  ;;  %v2059_v36 = vpack.c.bf16 %v1254_v34, %v1252_v33 }
 0x494   :  { %2024 = vmatprep.subr.bf16.mxu1 %v2023_v37  ;;  %v1251_v37 = vld [vmem:[#allocation13 + $0x2c0] sm:$0xff] }
 0x495   :  { %v2061_v41 = vpack.c.bf16 %v1253_v38, %v1251_v37 }
 0x497   :  { %2026 = vmatpush1.bf16.msra.mxu1 %v2025_v42  ;;  %v2063_v42 = vpack.c.bf16 %v1258_v40, %v1256_v39 }
 0x498   :  { %2028 = vmatprep.subr.bf16.mxu1 %v2027_v43  ;;  %v1255_v43 = vld [vmem:[#allocation13 + $0x2e0] sm:$0xff] }
 0x499   :  { %v2065_v47 = vpack.c.bf16 %v1257_v44, %v1255_v43 }
 0x49b   :  { %2030 = vmatpush1.bf16.msra.mxu1 %v2029_v46  ;;  %v1262_v46 = vld [vmem:[#allocation13 + $0x318] sm:$0xff] }
 0x49c   :  { %2032 = vmatprep.subr.bf16.mxu1 %v2031_v50  ;;  %v2067_v48 = vpack.c.bf16 %v1262_v46, %v1260_v45  ;;  %v1259_v50 = vld [vmem:[#allocation13 + $0x300] sm:$0xff] }
 0x49d   :  { %v2069_v53 = vpack.c.bf16 %v1261_v27, %v1259_v50 }
 0x49f   :  { %2034 = vmatpush1.bf16.msra.mxu1 %v2033_v52  ;;  %v1266_v52 = vld [vmem:[#allocation13 + $0x338] sm:$0xff] }
 0x4a0   :  { %2036 = vmatprep.subr.bf16.mxu1 %v2035_v56  ;;  %v2071_v54 = vpack.c.bf16 %v1266_v52, %v1264_v51  ;;  %v1263_v56 = vld [vmem:[#allocation13 + $0x320] sm:$0xff] }
 0x4a1   :  { %v2073_v61 = vpack.c.bf16 %v1265_v57, %v1263_v56 }
 0x535   :  { %v1083_v59 = vpop.f32.mrb[4].mxu1  ;;  %v2507_v60 = vpop.f32.mrb[6].mxu0 }
 0x536   :  { %v1085_v63 = vpop.f32.mrb[5].mxu1  ;;  %v1156_v0 = vpop.f32.mrb[7].mxu0  ;;  %v1159_v3 = vmax.f32 %v1083_v59, 0.0  ;;  %v1270_v59 = vld [vmem:[#allocation13 + $0x358] sm:$0xff]  ;;  %v1161_v33 = vmax.f32 %v2507_v60, 0.0 }
 0x537   :  { %v1160_v1 = vmax.f32 %v1085_v63, 0.0  ;;  %v1162_v6 = vmax.f32 %v1156_v0, 0.0  ;;  %v2075_v62 = vpack.c.bf16 %v1270_v59, %v1268_v58  ;;  %v1267_v63 = vld [vmem:[#allocation13 + $0x340] sm:$0xff]  ;;  %v1269_v0 = vld [vmem:[#allocation13 + $0x350] sm:$0xff] }
 0x539   :  { %1355 = vmatprep.mubr.f32.mxu1 %v1160_v1  ;;  %v1272_v1 = vld [vmem:[#allocation13 + $0x368] sm:$0xff] }
 0x53a   :  { %1356 = vmatmul.mubr.f32.vlgmr.msra.gmra.mrb[6].mxu1 %v1159_v3  ;;  %v2077_v3 = vpack.c.bf16 %v1269_v0, %v1267_v63 }
 0x53b   :  { %2038 = vmatpush1.bf16.msra.mxu1 %v2037_v2  ;;  %1426 = vmatprep.mubr.f32.mxu1 %v1162_v6  ;;  %v1274_v2 = vld [vmem:[#allocation13 + $0x378] sm:$0xff]  ;;  %v1276_v6 = vld [vmem:[#allocation13 + $0x388] sm:$0xff] }
 0x53c   :  { %2040 = vmatprep.subr.bf16.mxu1 %v2039_v49  ;;  %v2079_v49 = vpack.c.bf16 %v1274_v2, %v1272_v1 }
 0x53f   :  { %2042 = vmatpush1.bf16.msra.mxu1 %v2041_v55  ;;  %v2083_v55 = vpack.c.bf16 %v1278_v7, %v1276_v6 }
 0x540   :  { %2044 = vmatprep.subr.bf16.mxu1 %v2043_v9  ;;  %v1275_v9 = vld [vmem:[#allocation13 + $0x380] sm:$0xff] }
 0x541   :  { %v2085_v13 = vpack.c.bf16 %v1277_v10, %v1275_v9 }
 0x543   :  { %2046 = vmatpush1.bf16.msra.mxu1 %v2045_v14  ;;  %v2087_v14 = vpack.c.bf16 %v1282_v12, %v1280_v11 }
 0x544   :  { %2048 = vmatprep.subr.bf16.mxu1 %v2047_v15  ;;  %v1279_v15 = vld [vmem:[#allocation13 + $0x3a0] sm:$0xff] }
 0x545   :  { %v2089_v19 = vpack.c.bf16 %v1281_v16, %v1279_v15 }
 0x547   :  { %2050 = vmatpush1.bf16.msra.mxu1 %v2049_v20  ;;  %v2091_v20 = vpack.c.bf16 %v1286_v18, %v1284_v17 }
 0x548   :  { %2052 = vmatprep.subr.bf16.mxu1 %v2051_v21  ;;  %v1283_v21 = vld [vmem:[#allocation13 + $0x3c0] sm:$0xff] }
 0x549   :  { %v2093_v26 = vpack.c.bf16 %v1285_v22, %v1283_v21 }
 0x54b   :  { %2054 = vmatpush1.bf16.msra.mxu1 %v2053_v28  ;;  %v2095_v28 = vpack.c.bf16 %v1290_v24, %v1288_v23 }
 0x54c   :  { %2056 = vmatprep.subr.bf16.mxu1 %v2055_v29  ;;  %v1287_v29 = vld [vmem:[#allocation13 + $0x3e0] sm:$0xff] }
 0x54d   :  { %v2097_v31 = vpack.c.bf16 %v1289_v30, %v1287_v29 }
 0x54f   :  { %2058 = vmatpush1.bf16.msra.mxu1 %v2057_v35 }
 0x550   :  { %2060 = vmatprep.subr.bf16.mxu1 %v2059_v36 }
 0x553   :  { %2062 = vmatpush1.bf16.msra.mxu1 %v2061_v41 }
 0x554   :  { %2064 = vmatprep.subr.bf16.mxu1 %v2063_v42 }
 0x557   :  { %2066 = vmatpush1.bf16.msra.mxu1 %v2065_v47 }
 0x558   :  { %2068 = vmatprep.subr.bf16.mxu1 %v2067_v48 }
 0x55b   :  { %2070 = vmatpush1.bf16.msra.mxu1 %v2069_v53 }
 0x55c   :  { %2072 = vmatprep.subr.bf16.mxu1 %v2071_v54 }
 0x55f   :  { %2074 = vmatpush1.bf16.msra.mxu1 %v2073_v61 }
 0x560   :  { %2076 = vmatprep.subr.bf16.mxu1 %v2075_v62 }
 0x563   :  { %2078 = vmatpush1.bf16.msra.mxu1 %v2077_v3 }
 0x564   :  { %2080 = vmatprep.subr.bf16.mxu1 %v2079_v49 }
 0x567   :  { %2082 = vmatpush1.bf16.msra.mxu1 %v2081_v8 }
 0x568   :  { %2084 = vmatprep.subr.bf16.mxu1 %v2083_v55 }
 0x56b   :  { %2086 = vmatpush1.bf16.msra.mxu1 %v2085_v13 }
 0x56c   :  { %2088 = vmatprep.subr.bf16.mxu1 %v2087_v14 }
 0x56f   :  { %2090 = vmatpush1.bf16.msra.mxu1 %v2089_v19 }
 0x570   :  { %2092 = vmatprep.subr.bf16.mxu1 %v2091_v20 }
 0x573   :  { %2094 = vmatpush1.bf16.msra.mxu1 %v2093_v26 }
 0x574   :  { %2096 = vmatprep.subr.bf16.mxu1 %v2095_v28 }
 0x577   :  { %2098 = vmatpush1.bf16.msra.mxu1 %v2097_v31 }
 0x57a   :  { %1427 = vmatmul.mubr.f32.vlgmr.msra.gmra.mrb[6].mxu1 %v1161_v33 }
 0x57b   :  { %2285 = shalt.err (!%p2282_p4)
}
 0x57c   :  { %s2286_s24 = scalar_lea.hbm %s2544_s8, 16 }
 0x57d   :  { %p2287_p5 = scmp.ne.s32.totalorder %s2544_s8, %s2286_s24  ;;  %p2290_p6 = scmp.lt.u32.totalorder %s2286_s24, %s2544_s8 }
 0x57f   :  { %p2292_p7 = pnand %p2290_p6, %p2287_p5 }
 0x581   :  { %2295 = shalt.err (!%p2292_p7)
}
 0x582   :  { %1475 = dma.vmem_to_hbm [thread:$0]  %s1473_s0, 16, %s2544_s8, [#allocation16]   ;;  %v2345_v60 = vmov 1966171168   ;;  %vm1453_vm0 = vcmp.lt.s32.totalorder %v253_v25, 256 }
 0x583   :  { %v1437_v34 = vunpack.c.l.s4 %v2345_v60  ;;  %s2346_s30 = smov [#allocation14]  }
 0x584   :  { %s1462_s9 = sshll.u32 %s2346_s30, 4  ;;  %s1463_s9 = int_to_ptr.vmem [resolvable:$true] %s1462_s9 }
 0x585   :  { %v1438_v35 = vunpack.c.0.s8 %v1437_v34  ;;  %s2296_s5 = scalar_lea.vmem %s1463_s9, 32  ;;  %p2301_p9 = scmp.lt.s32.totalorder %s1463_s9, %s1463_s9 }
 0x586   :  { %p2297_p8 = scmp.ne.s32.totalorder %s1463_s9, %s2296_s5  ;;  %p2302_p10 = scmp.lt.s32.totalorder %s2296_s5, %s2296_s5 }
 0x587   :  { %v1441_v37 = vsub.s32 %v1438_v35, %v2492_v32 }
 0x588   :  { %p2303_p11 = por %p2302_p10, %p2301_p9 }
 0x58a   :  { %p2304_p12 = pnand %p2303_p11, %p2297_p8 }
 0x64d   :  { %v1428_v36 = vpop.f32.mrb[6].mxu1 }
 0x64e   :  { %v1430_v38 = vpop.f32.mrb[7].mxu1 }
 0x64f   :  { %v1435_v39 = vcombine.low %v1428_v36, %v1430_v38 }
 0x651   :  { %v1442_v40 = vrot.slane %v1435_v39, %v1441_v37 }
 0x653   :  { %v1449_v41 = vrot.slane %v1442_v40, %v1441_v37 }
 0x655   :  { %1455 = vst.msk [vmem:[#allocation14] sm:$0x3] %vm1453_vm0, %v1449_v41 }
 0x656   :  { %2307 = shalt.err (!%p2304_p12)
}
 0x657   :  { %s2308_s15 = scalar_lea.hbm %s2543_s7, 32 }
 0x658   :  { %p2309_p13 = scmp.ne.s32.totalorder %s2543_s7, %s2308_s15  ;;  %p2312_p0 = scmp.lt.u32.totalorder %s2308_s15, %s2543_s7 }
 0x65a   :  { %p2314_p1 = pnand %p2312_p0, %p2309_p13 }
 0x65c   :  { %2317 = shalt.err (!%p2314_p1)
}
 0x65d   :  { %1465 = dma.vmem_to_hbm [thread:$0]  %s1463_s9, 32, %s2543_s7, [#allocation4]  }
 0x65e   :  { %2326 = dma.done.wait [#allocation4], 32  }
 0x65f   :  { %2327 = vsyncadd [#allocation4], 4294967264 }
 0x660   :  { %2328 = dma.done.wait [#allocation16], 16  }
 0x661   :  { %2329 = vsyncadd [#allocation16], 4294967280 }
 0x662   :  { %1482 = vsyncpa [#allocation3], 1 }
 0x663   :  { %1483 = vsyncpa [#allocation6], 1 }
 0x664   :  { %1484 = vsyncpa [#allocation9], 1 }
 0x665   :  { %1485 = vsyncpa [#allocation12], 1 }
 0x666   :  { %1486 = vsyncpa [#allocation4], 1 }
 0x667   :  { %1487 = vsyncpa [#allocation16], 1 }

</bundles_post_ra>
